<compile_context>
chip_gen: v7x
topology: tpu7x:2x2x1
jax: 0.10.0
libtpu: 0.0.40
codegen_flags: <defaults>
</compile_context>

<pallas_src>
import jax
import jax.numpy as jnp
from jax import lax
from jax.experimental import pallas as pl
from jax.experimental.pallas import tpu as pltpu

LANE = 128  # TPU lane width


def _round_up(x, m):
    return (x + m - 1) // m * m


# ------------------------------------------------------------------ kernel ---
def _gru_fc_kernel(h0_ref, x_ref,
                   wi_ref, wh_ref, bi_ref, bhn_ref,
                   wfc_ref, bfc_ref,
                   out_ref,
                   xg_scr, hs_scr):
    """GRU recurrence over time + deferred lane-dense Linear.

    h0_ref : (B, Hp)       initial hidden state, lane-padded with zeros
    x_ref  : (T*B, F)      time-major flattened input (row t*B + b)
    wi_ref : (F, 3G)       fused input weights  [W_ir | W_iz | W_in], each gate
                           block lane-padded to G columns
    wh_ref : (Hp, 3G)      fused hidden weights [W_hr | W_hz | W_hn], padded
                           rows/cols are exactly zero
    bi_ref : (1, 3G)       fused biases [b_ir+b_hr | b_iz+b_hz | b_in]
    bhn_ref: (1, G)        b_hn (must stay inside r*(...))
    wfc_ref: (Hp, LANE)    fc weight, zero-padded to a lane-dense output
    bfc_ref: (1, LANE)     fc bias, zero-padded
    out_ref: (T*B, LANE)   per-step logits in columns [0:2], zeros elsewhere
    xg_scr : (T*B, 3G)     VMEM scratch: precomputed input-gate activations
    hs_scr : (T*B, Hp)     VMEM scratch: per-step hidden states (for deferred fc)
    """
    B, Hp = h0_ref.shape
    TB, _ = x_ref.shape
    T = TB // B
    G = wi_ref.shape[1] // 3

    # ---- hoisted input path: one matmul for all timesteps (non-recurrent) -----
    xg_scr[...] = (
        jnp.dot(x_ref[...], wi_ref[...], preferred_element_type=jnp.float32)
        + bi_ref[...]
    )

    wh = wh_ref[...]                                   # (Hp, 3G), hoisted load
    # Hoist the (1,G)->(B,G) broadcast out of the unrolled loop.
    bhn = jnp.broadcast_to(bhn_ref[...], (B, G))

    # ---- serial recurrence: one fused (B,Hp)@(Hp,3G) matmul per step ----------
    # Static, fully-unrolled loop (T is small); all row offsets are static so
    # every scratch access is a plain static sublane slice (no dynamic indexing).
    h = h0_ref[...]
    for t in range(T):
        rows = pl.ds(t * B, B)                         # static row window
        xg = xg_scr[rows]                              # (B, 3G)
        hg = jnp.dot(h, wh, preferred_element_type=jnp.float32)    # (B, 3G)

        # Gate blocks are G(=128)-lane aligned: slices below are tile-aligned.
        r = jax.nn.sigmoid(xg[:, 0:G]     + hg[:, 0:G])
        z = jax.nn.sigmoid(xg[:, G:2 * G] + hg[:, G:2 * G])
        n = jnp.tanh(xg[:, 2 * G:3 * G] + r * (hg[:, 2 * G:3 * G] + bhn))
        h = (1.0 - z) * n + z * h                      # padded lanes stay 0

        hs_scr[rows] = h

    # ---- deferred fc: one (T*B,Hp)@(Hp,128) matmul, lane-dense store ----------
    out_ref[...] = (
        jnp.dot(hs_scr[...], wfc_ref[...], preferred_element_type=jnp.float32)
        + bfc_ref[...]
    )


# ----------------------------------------------------------------- wrapper ---
@jax.jit
def param_sorter_forward(h, param, fused):
    """h: (B, F), param: (B, T, F), fused: pre-fused weights -> (B, T, 2)."""
    B, T, F = param.shape
    Hp = fused["wh"].shape[0]
    G = fused["wi"].shape[1] // 3

    # Time-major flat rows: row t*B + b == param[b, t].
    # TODO(synk): for production sizes, avoid this HBM transpose by reading
    # batch-first rows with a strided index_map / pl.ds(stride=T) in the kernel.
    x_flat = jnp.transpose(param, (1, 0, 2)).reshape(T * B, F)
    h0 = jnp.pad(h, ((0, 0), (0, Hp - F)))             # lane-pad hidden state

    out = pl.pallas_call(
        _gru_fc_kernel,
        out_shape=jax.ShapeDtypeStruct((T * B, LANE), jnp.float32),
        scratch_shapes=[
            pltpu.VMEM((T * B, 3 * G), jnp.float32),   # precomputed input gates
            pltpu.VMEM((T * B, Hp), jnp.float32),      # per-step hidden states
        ],
        # NOTE: at large T*B, chunk the time axis with a grid ("arbitrary") and
        # persistent-h scratch to respect v7x's 64 MiB VMEM / v5e's 16 MiB
        # default scoped limit; unnecessary at these sizes.
    )(h0, x_flat, fused["wi"], fused["wh"], fused["bi"], fused["bhn"],
      fused["wfc"], fused["bfc"])

    # Lane-dense kernel output: real logits are columns [0:2].
    return jnp.transpose(out.reshape(T, B, LANE)[:, :, :2], (1, 0, 2))


# ------------------------------------------------- one-time weight fusion ---
def prepare_fused_params(params, feature_in):
    """Fuse / transpose / zero-pad GRU+FC weights ONCE (outside the hot path)."""
    F = feature_in
    G = max(LANE, _round_up(F, LANE))   # per-gate lane-padded width
    Hp = G                              # padded hidden width carried in-kernel

    def pad_cols(w, width):
        return jnp.pad(w, ((0, 0), (0, width - w.shape[1])))

    def pad_rows(w, rows):
        return jnp.pad(w, ((0, rows - w.shape[0]), (0, 0)))

    wi = jnp.concatenate([pad_cols(params["wir"], G),
                          pad_cols(params["wiz"], G),
                          pad_cols(params["win"], G)], axis=1)          # (F, 3G)
    wh = jnp.concatenate([pad_cols(pad_rows(params["whr"], Hp), G),
                          pad_cols(pad_rows(params["whz"], Hp), G),
                          pad_cols(pad_rows(params["whn"], Hp), G)], axis=1)  # (Hp, 3G)
    # Fold b_hr / b_hz into the hoisted input-path bias; only b_hn stays inside.
    bi = jnp.concatenate([pad_cols(params["bir"] + params["bhr"], G),
                          pad_cols(params["biz"] + params["bhz"], G),
                          pad_cols(params["bin"], G)], axis=1)           # (1, 3G)
    bhn = pad_cols(params["bhn"], G)                                     # (1, G)
    wfc = pad_cols(pad_rows(params["wfc"], Hp), LANE)                    # (Hp, 128)
    bfc = pad_cols(params["bfc"], LANE)                                  # (1, 128)

    return {"wi": wi, "wh": wh, "bi": bi, "bhn": bhn, "wfc": wfc, "bfc": bfc}


# -------------------------------------------------------- parameter set-up ---
def init_params(key, feature_in):
    """Deterministic init matching PyTorch shapes (GRU weight_ih/hh (3F,F),
    biases (3F,), fc weight (2,F), fc bias (2,)) — stored split and transposed
    for x @ W."""
    F = feature_in
    k = 1.0 / jnp.sqrt(F)
    keys = jax.random.split(key, 16)

    def u(kk, shape):
        return jax.random.uniform(kk, shape, jnp.float32, -k, k)

    return {
        # input-to-hidden (r, z, n), transposed to (F, F)
        "wir": u(keys[0], (F, F)), "wiz": u(keys[1], (F, F)), "win": u(keys[2], (F, F)),
        # hidden-to-hidden (r, z, n)
        "whr": u(keys[3], (F, F)), "whz": u(keys[4], (F, F)), "whn": u(keys[5], (F, F)),
        # biases kept 2-D (1, F) for clean broadcasting
        "bir": u(keys[6], (1, F)), "biz": u(keys[7], (1, F)), "bin": u(keys[8], (1, F)),
        "bhr": u(keys[9], (1, F)), "bhz": u(keys[10], (1, F)), "bhn": u(keys[11], (1, F)),
        # fc: Linear(F, 2) -> weight transposed to (F, 2)
        "wfc": u(keys[12], (F, 2)), "bfc": u(keys[13], (1, 2)),
    }


# ----------------------------------------------------- pure-JAX reference ---
def reference_forward(h, param, p):
    def cell(h_prev, x):
        r = jax.nn.sigmoid(x @ p["wir"] + h_prev @ p["whr"] + p["bir"] + p["bhr"])
        z = jax.nn.sigmoid(x @ p["wiz"] + h_prev @ p["whz"] + p["biz"] + p["bhz"])
        n = jnp.tanh(x @ p["win"] + p["bin"] + r * (h_prev @ p["whn"] + p["bhn"]))
        h_new = (1.0 - z) * n + z * h_prev
        return h_new, h_new

    x_tm = jnp.transpose(param, (1, 0, 2))             # (T, B, F)
    _, outs = lax.scan(cell, h, x_tm)                  # (T, B, F)
    pred = outs @ p["wfc"] + p["bfc"]                  # (T, B, 2)
    return jnp.transpose(pred, (1, 0, 2))              # (B, T, 2)


# -------------------------------------------------------------------- main ---
if __name__ == "__main__":
    B, T, F = 2, 8, 32   # batch, sequence length, feature_in

    key = jax.random.PRNGKey(0)
    k_h, k_x, k_p = jax.random.split(key, 3)

    h = jax.random.normal(k_h, (B, F), jnp.float32)             # initial hidden
    param = jax.random.normal(k_x, (B, T, F), jnp.float32)      # input sequence
    params = init_params(k_p, F)

    fused = prepare_fused_params(params, F)                     # one-time prep
    fused = jax.tree_util.tree_map(jax.block_until_ready, fused)

    pred = param_sorter_forward(h, param, fused)
    pred = jax.block_until_ready(pred)

    ref = reference_forward(h, param, params)
    assert pred.shape == (B, T, 2), pred.shape
    assert jnp.allclose(pred, ref, rtol=1e-4, atol=1e-4), (
        float(jnp.max(jnp.abs(pred - ref))))

    print("KERNEL_OK")
</pallas_src>

<mosaic_0001>
module attributes {stable_mosaic.version = 11 : i64} {
  func.func @_gru_fc_kernel(%arg0: memref<2x128xf32, #tpu.memory_space<vmem>>, %arg1: memref<16x32xf32, #tpu.memory_space<vmem>>, %arg2: memref<32x384xf32, #tpu.memory_space<vmem>>, %arg3: memref<128x384xf32, #tpu.memory_space<vmem>>, %arg4: memref<1x384xf32, #tpu.memory_space<vmem>>, %arg5: memref<1x128xf32, #tpu.memory_space<vmem>>, %arg6: memref<128x128xf32, #tpu.memory_space<vmem>>, %arg7: memref<1x128xf32, #tpu.memory_space<vmem>>, %arg8: memref<16x128xf32, #tpu.memory_space<vmem>>, %arg9: memref<16x384xf32, #tpu.memory_space<vmem>>, %arg10: memref<16x128xf32, #tpu.memory_space<vmem>>) attributes {dimension_semantics = [], scalar_prefetch = 0 : i64, scratch_operands = 2 : i64, tpu.core_type = #tpu.core_type<tc>} {
    %c0 = arith.constant 0 : index
    %c0_0 = arith.constant 0 : index
    %0 = vector.load %arg1[%c0, %c0_0] : memref<16x32xf32, #tpu.memory_space<vmem>>, vector<16x32xf32>
    %c0_1 = arith.constant 0 : index
    %c0_2 = arith.constant 0 : index
    %1 = vector.load %arg2[%c0_1, %c0_2] : memref<32x384xf32, #tpu.memory_space<vmem>>, vector<32x384xf32>
    %cst = arith.constant dense<0.000000e+00> : vector<16x384xf32>
    %2 = tpu.matmul %0, %1, %cst {dimension_numbers = #tpu.dot_dimension_numbers<[1], [0], [0], [1], [0, 0, 1, 1], [], []>} : vector<16x32xf32>, vector<32x384xf32>, vector<16x384xf32> -> vector<16x384xf32>
    %c0_3 = arith.constant 0 : index
    %c0_4 = arith.constant 0 : index
    %3 = vector.load %arg4[%c0_3, %c0_4] : memref<1x384xf32, #tpu.memory_space<vmem>>, vector<1x384xf32>
    %4 = vector.broadcast %3 : vector<1x384xf32> to vector<16x384xf32>
    %5 = arith.addf %2, %4 : vector<16x384xf32>
    %c0_5 = arith.constant 0 : index
    %c0_6 = arith.constant 0 : index
    %6 = vector.load %arg9[%c0_5, %c0_6] : memref<16x384xf32, #tpu.memory_space<vmem>>, vector<16x384xf32>
    tpu.vector_store %arg9[%c0_5, %c0_6], %5 {strides = array<i32>} : memref<16x384xf32, #tpu.memory_space<vmem>>, vector<16x384xf32>,
    %c0_7 = arith.constant 0 : index
    %c0_8 = arith.constant 0 : index
    %7 = vector.load %arg3[%c0_7, %c0_8] : memref<128x384xf32, #tpu.memory_space<vmem>>, vector<128x384xf32>
    %c0_9 = arith.constant 0 : index
    %c0_10 = arith.constant 0 : index
    %8 = vector.load %arg5[%c0_9, %c0_10] : memref<1x128xf32, #tpu.memory_space<vmem>>, vector<1x128xf32>
    %9 = vector.shape_cast %8 : vector<1x128xf32> to vector<1x128xf32>
    %10 = vector.broadcast %9 : vector<1x128xf32> to vector<2x128xf32>
    %c0_11 = arith.constant 0 : index
    %c0_12 = arith.constant 0 : index
    %11 = vector.load %arg0[%c0_11, %c0_12] : memref<2x128xf32, #tpu.memory_space<vmem>>, vector<2x128xf32>
    %c0_13 = arith.constant 0 : index
    %c0_14 = arith.constant 0 : index
    %12 = vector.load %arg9[%c0_13, %c0_14] : memref<16x384xf32, #tpu.memory_space<vmem>>, vector<2x384xf32>
    %cst_15 = arith.constant dense<0.000000e+00> : vector<2x384xf32>
    %13 = tpu.matmul %11, %7, %cst_15 {dimension_numbers = #tpu.dot_dimension_numbers<[1], [0], [0], [1], [0, 0, 1, 1], [], []>} : vector<2x128xf32>, vector<128x384xf32>, vector<2x384xf32> -> vector<2x384xf32>
    %14 = vector.extract_strided_slice %12 {offsets = [0, 0], sizes = [2, 128], strides = [1, 1]} : vector<2x384xf32> to vector<2x128xf32>
    %15 = vector.extract_strided_slice %13 {offsets = [0, 0], sizes = [2, 128], strides = [1, 1]} : vector<2x384xf32> to vector<2x128xf32>
    %16 = arith.addf %14, %15 : vector<2x128xf32>
    %17 = arith.negf %16 : vector<2x128xf32>
    %18 = math.exp %17 : vector<2x128xf32>
    %cst_16 = arith.constant 1.000000e+00 : f32
    %19 = vector.broadcast %cst_16 : f32 to vector<2x128xf32>
    %20 = arith.addf %19, %18 : vector<2x128xf32>
    %21 = arith.divf %19, %20 : vector<2x128xf32>
    %22 = vector.extract_strided_slice %12 {offsets = [0, 128], sizes = [2, 128], strides = [1, 1]} : vector<2x384xf32> to vector<2x128xf32>
    %23 = vector.extract_strided_slice %13 {offsets = [0, 128], sizes = [2, 128], strides = [1, 1]} : vector<2x384xf32> to vector<2x128xf32>
    %24 = arith.addf %22, %23 : vector<2x128xf32>
    %25 = arith.negf %24 : vector<2x128xf32>
    %26 = math.exp %25 : vector<2x128xf32>
    %cst_17 = arith.constant 1.000000e+00 : f32
    %27 = vector.broadcast %cst_17 : f32 to vector<2x128xf32>
    %28 = arith.addf %27, %26 : vector<2x128xf32>
    %29 = arith.divf %27, %28 : vector<2x128xf32>
    %30 = vector.extract_strided_slice %12 {offsets = [0, 256], sizes = [2, 128], strides = [1, 1]} : vector<2x384xf32> to vector<2x128xf32>
    %31 = vector.extract_strided_slice %13 {offsets = [0, 256], sizes = [2, 128], strides = [1, 1]} : vector<2x384xf32> to vector<2x128xf32>
    %32 = arith.addf %31, %10 : vector<2x128xf32>
    %33 = arith.mulf %21, %32 : vector<2x128xf32>
    %34 = arith.addf %30, %33 : vector<2x128xf32>
    %35 = math.tanh %34 : vector<2x128xf32>
    %cst_18 = arith.constant 1.000000e+00 : f32
    %36 = vector.broadcast %cst_18 : f32 to vector<2x128xf32>
    %37 = arith.subf %36, %29 : vector<2x128xf32>
    %38 = arith.mulf %37, %35 : vector<2x128xf32>
    %39 = arith.mulf %29, %11 : vector<2x128xf32>
    %40 = arith.addf %38, %39 : vector<2x128xf32>
    %c0_19 = arith.constant 0 : index
    %c0_20 = arith.constant 0 : index
    %41 = vector.load %arg10[%c0_19, %c0_20] : memref<16x128xf32, #tpu.memory_space<vmem>>, vector<2x128xf32>
    tpu.vector_store %arg10[%c0_19, %c0_20], %40 {strides = array<i32>} : memref<16x128xf32, #tpu.memory_space<vmem>>, vector<2x128xf32>,
    %c2 = arith.constant 2 : index
    %c0_21 = arith.constant 0 : index
    %42 = vector.load %arg9[%c2, %c0_21] : memref<16x384xf32, #tpu.memory_space<vmem>>, vector<2x384xf32>
    %cst_22 = arith.constant dense<0.000000e+00> : vector<2x384xf32>
    %43 = tpu.matmul %40, %7, %cst_22 {dimension_numbers = #tpu.dot_dimension_numbers<[1], [0], [0], [1], [0, 0, 1, 1], [], []>} : vector<2x128xf32>, vector<128x384xf32>, vector<2x384xf32> -> vector<2x384xf32>
    %44 = vector.extract_strided_slice %42 {offsets = [0, 0], sizes = [2, 128], strides = [1, 1]} : vector<2x384xf32> to vector<2x128xf32>
    %45 = vector.extract_strided_slice %43 {offsets = [0, 0], sizes = [2, 128], strides = [1, 1]} : vector<2x384xf32> to vector<2x128xf32>
    %46 = arith.addf %44, %45 : vector<2x128xf32>
    %47 = arith.negf %46 : vector<2x128xf32>
    %48 = math.exp %47 : vector<2x128xf32>
    %cst_23 = arith.constant 1.000000e+00 : f32
    %49 = vector.broadcast %cst_23 : f32 to vector<2x128xf32>
    %50 = arith.addf %49, %48 : vector<2x128xf32>
    %51 = arith.divf %49, %50 : vector<2x128xf32>
    %52 = vector.extract_strided_slice %42 {offsets = [0, 128], sizes = [2, 128], strides = [1, 1]} : vector<2x384xf32> to vector<2x128xf32>
    %53 = vector.extract_strided_slice %43 {offsets = [0, 128], sizes = [2, 128], strides = [1, 1]} : vector<2x384xf32> to vector<2x128xf32>
    %54 = arith.addf %52, %53 : vector<2x128xf32>
    %55 = arith.negf %54 : vector<2x128xf32>
    %56 = math.exp %55 : vector<2x128xf32>
    %cst_24 = arith.constant 1.000000e+00 : f32
    %57 = vector.broadcast %cst_24 : f32 to vector<2x128xf32>
    %58 = arith.addf %57, %56 : vector<2x128xf32>
    %59 = arith.divf %57, %58 : vector<2x128xf32>
    %60 = vector.extract_strided_slice %42 {offsets = [0, 256], sizes = [2, 128], strides = [1, 1]} : vector<2x384xf32> to vector<2x128xf32>
    %61 = vector.extract_strided_slice %43 {offsets = [0, 256], sizes = [2, 128], strides = [1, 1]} : vector<2x384xf32> to vector<2x128xf32>
    %62 = arith.addf %61, %10 : vector<2x128xf32>
    %63 = arith.mulf %51, %62 : vector<2x128xf32>
    %64 = arith.addf %60, %63 : vector<2x128xf32>
    %65 = math.tanh %64 : vector<2x128xf32>
    %cst_25 = arith.constant 1.000000e+00 : f32
    %66 = vector.broadcast %cst_25 : f32 to vector<2x128xf32>
    %67 = arith.subf %66, %59 : vector<2x128xf32>
    %68 = arith.mulf %67, %65 : vector<2x128xf32>
    %69 = arith.mulf %59, %40 : vector<2x128xf32>
    %70 = arith.addf %68, %69 : vector<2x128xf32>
    %c2_26 = arith.constant 2 : index
    %c0_27 = arith.constant 0 : index
    %71 = vector.load %arg10[%c2_26, %c0_27] : memref<16x128xf32, #tpu.memory_space<vmem>>, vector<2x128xf32>
    tpu.vector_store %arg10[%c2_26, %c0_27], %70 {strides = array<i32>} : memref<16x128xf32, #tpu.memory_space<vmem>>, vector<2x128xf32>,
    %c4 = arith.constant 4 : index
    %c0_28 = arith.constant 0 : index
    %72 = vector.load %arg9[%c4, %c0_28] : memref<16x384xf32, #tpu.memory_space<vmem>>, vector<2x384xf32>
    %cst_29 = arith.constant dense<0.000000e+00> : vector<2x384xf32>
    %73 = tpu.matmul %70, %7, %cst_29 {dimension_numbers = #tpu.dot_dimension_numbers<[1], [0], [0], [1], [0, 0, 1, 1], [], []>} : vector<2x128xf32>, vector<128x384xf32>, vector<2x384xf32> -> vector<2x384xf32>
    %74 = vector.extract_strided_slice %72 {offsets = [0, 0], sizes = [2, 128], strides = [1, 1]} : vector<2x384xf32> to vector<2x128xf32>
    %75 = vector.extract_strided_slice %73 {offsets = [0, 0], sizes = [2, 128], strides = [1, 1]} : vector<2x384xf32> to vector<2x128xf32>
    %76 = arith.addf %74, %75 : vector<2x128xf32>
    %77 = arith.negf %76 : vector<2x128xf32>
    %78 = math.exp %77 : vector<2x128xf32>
    %cst_30 = arith.constant 1.000000e+00 : f32
    %79 = vector.broadcast %cst_30 : f32 to vector<2x128xf32>
    %80 = arith.addf %79, %78 : vector<2x128xf32>
    %81 = arith.divf %79, %80 : vector<2x128xf32>
    %82 = vector.extract_strided_slice %72 {offsets = [0, 128], sizes = [2, 128], strides = [1, 1]} : vector<2x384xf32> to vector<2x128xf32>
    %83 = vector.extract_strided_slice %73 {offsets = [0, 128], sizes = [2, 128], strides = [1, 1]} : vector<2x384xf32> to vector<2x128xf32>
    %84 = arith.addf %82, %83 : vector<2x128xf32>
    %85 = arith.negf %84 : vector<2x128xf32>
    %86 = math.exp %85 : vector<2x128xf32>
    %cst_31 = arith.constant 1.000000e+00 : f32
    %87 = vector.broadcast %cst_31 : f32 to vector<2x128xf32>
    %88 = arith.addf %87, %86 : vector<2x128xf32>
    %89 = arith.divf %87, %88 : vector<2x128xf32>
    %90 = vector.extract_strided_slice %72 {offsets = [0, 256], sizes = [2, 128], strides = [1, 1]} : vector<2x384xf32> to vector<2x128xf32>
    %91 = vector.extract_strided_slice %73 {offsets = [0, 256], sizes = [2, 128], strides = [1, 1]} : vector<2x384xf32> to vector<2x128xf32>
    %92 = arith.addf %91, %10 : vector<2x128xf32>
    %93 = arith.mulf %81, %92 : vector<2x128xf32>
    %94 = arith.addf %90, %93 : vector<2x128xf32>
    %95 = math.tanh %94 : vector<2x128xf32>
    %cst_32 = arith.constant 1.000000e+00 : f32
    %96 = vector.broadcast %cst_32 : f32 to vector<2x128xf32>
    %97 = arith.subf %96, %89 : vector<2x128xf32>
    %98 = arith.mulf %97, %95 : vector<2x128xf32>
    %99 = arith.mulf %89, %70 : vector<2x128xf32>
    %100 = arith.addf %98, %99 : vector<2x128xf32>
    %c4_33 = arith.constant 4 : index
    %c0_34 = arith.constant 0 : index
    %101 = vector.load %arg10[%c4_33, %c0_34] : memref<16x128xf32, #tpu.memory_space<vmem>>, vector<2x128xf32>
    tpu.vector_store %arg10[%c4_33, %c0_34], %100 {strides = array<i32>} : memref<16x128xf32, #tpu.memory_space<vmem>>, vector<2x128xf32>,
    %c6 = arith.constant 6 : index
    %c0_35 = arith.constant 0 : index
    %102 = vector.load %arg9[%c6, %c0_35] : memref<16x384xf32, #tpu.memory_space<vmem>>, vector<2x384xf32>
    %cst_36 = arith.constant dense<0.000000e+00> : vector<2x384xf32>
    %103 = tpu.matmul %100, %7, %cst_36 {dimension_numbers = #tpu.dot_dimension_numbers<[1], [0], [0], [1], [0, 0, 1, 1], [], []>} : vector<2x128xf32>, vector<128x384xf32>, vector<2x384xf32> -> vector<2x384xf32>
    %104 = vector.extract_strided_slice %102 {offsets = [0, 0], sizes = [2, 128], strides = [1, 1]} : vector<2x384xf32> to vector<2x128xf32>
    %105 = vector.extract_strided_slice %103 {offsets = [0, 0], sizes = [2, 128], strides = [1, 1]} : vector<2x384xf32> to vector<2x128xf32>
    %106 = arith.addf %104, %105 : vector<2x128xf32>
    %107 = arith.negf %106 : vector<2x128xf32>
    %108 = math.exp %107 : vector<2x128xf32>
    %cst_37 = arith.constant 1.000000e+00 : f32
    %109 = vector.broadcast %cst_37 : f32 to vector<2x128xf32>
    %110 = arith.addf %109, %108 : vector<2x128xf32>
    %111 = arith.divf %109, %110 : vector<2x128xf32>
    %112 = vector.extract_strided_slice %102 {offsets = [0, 128], sizes = [2, 128], strides = [1, 1]} : vector<2x384xf32> to vector<2x128xf32>
    %113 = vector.extract_strided_slice %103 {offsets = [0, 128], sizes = [2, 128], strides = [1, 1]} : vector<2x384xf32> to vector<2x128xf32>
    %114 = arith.addf %112, %113 : vector<2x128xf32>
    %115 = arith.negf %114 : vector<2x128xf32>
    %116 = math.exp %115 : vector<2x128xf32>
    %cst_38 = arith.constant 1.000000e+00 : f32
    %117 = vector.broadcast %cst_38 : f32 to vector<2x128xf32>
    %118 = arith.addf %117, %116 : vector<2x128xf32>
    %119 = arith.divf %117, %118 : vector<2x128xf32>
    %120 = vector.extract_strided_slice %102 {offsets = [0, 256], sizes = [2, 128], strides = [1, 1]} : vector<2x384xf32> to vector<2x128xf32>
    %121 = vector.extract_strided_slice %103 {offsets = [0, 256], sizes = [2, 128], strides = [1, 1]} : vector<2x384xf32> to vector<2x128xf32>
    %122 = arith.addf %121, %10 : vector<2x128xf32>
    %123 = arith.mulf %111, %122 : vector<2x128xf32>
    %124 = arith.addf %120, %123 : vector<2x128xf32>
    %125 = math.tanh %124 : vector<2x128xf32>
    %cst_39 = arith.constant 1.000000e+00 : f32
    %126 = vector.broadcast %cst_39 : f32 to vector<2x128xf32>
    %127 = arith.subf %126, %119 : vector<2x128xf32>
    %128 = arith.mulf %127, %125 : vector<2x128xf32>
    %129 = arith.mulf %119, %100 : vector<2x128xf32>
    %130 = arith.addf %128, %129 : vector<2x128xf32>
    %c6_40 = arith.constant 6 : index
    %c0_41 = arith.constant 0 : index
    %131 = vector.load %arg10[%c6_40, %c0_41] : memref<16x128xf32, #tpu.memory_space<vmem>>, vector<2x128xf32>
    tpu.vector_store %arg10[%c6_40, %c0_41], %130 {strides = array<i32>} : memref<16x128xf32, #tpu.memory_space<vmem>>, vector<2x128xf32>,
    %c8 = arith.constant 8 : index
    %c0_42 = arith.constant 0 : index
    %132 = vector.load %arg9[%c8, %c0_42] : memref<16x384xf32, #tpu.memory_space<vmem>>, vector<2x384xf32>
    %cst_43 = arith.constant dense<0.000000e+00> : vector<2x384xf32>
    %133 = tpu.matmul %130, %7, %cst_43 {dimension_numbers = #tpu.dot_dimension_numbers<[1], [0], [0], [1], [0, 0, 1, 1], [], []>} : vector<2x128xf32>, vector<128x384xf32>, vector<2x384xf32> -> vector<2x384xf32>
    %134 = vector.extract_strided_slice %132 {offsets = [0, 0], sizes = [2, 128], strides = [1, 1]} : vector<2x384xf32> to vector<2x128xf32>
    %135 = vector.extract_strided_slice %133 {offsets = [0, 0], sizes = [2, 128], strides = [1, 1]} : vector<2x384xf32> to vector<2x128xf32>
    %136 = arith.addf %134, %135 : vector<2x128xf32>
    %137 = arith.negf %136 : vector<2x128xf32>
    %138 = math.exp %137 : vector<2x128xf32>
    %cst_44 = arith.constant 1.000000e+00 : f32
    %139 = vector.broadcast %cst_44 : f32 to vector<2x128xf32>
    %140 = arith.addf %139, %138 : vector<2x128xf32>
    %141 = arith.divf %139, %140 : vector<2x128xf32>
    %142 = vector.extract_strided_slice %132 {offsets = [0, 128], sizes = [2, 128], strides = [1, 1]} : vector<2x384xf32> to vector<2x128xf32>
    %143 = vector.extract_strided_slice %133 {offsets = [0, 128], sizes = [2, 128], strides = [1, 1]} : vector<2x384xf32> to vector<2x128xf32>
    %144 = arith.addf %142, %143 : vector<2x128xf32>
    %145 = arith.negf %144 : vector<2x128xf32>
    %146 = math.exp %145 : vector<2x128xf32>
    %cst_45 = arith.constant 1.000000e+00 : f32
    %147 = vector.broadcast %cst_45 : f32 to vector<2x128xf32>
    %148 = arith.addf %147, %146 : vector<2x128xf32>
    %149 = arith.divf %147, %148 : vector<2x128xf32>
    %150 = vector.extract_strided_slice %132 {offsets = [0, 256], sizes = [2, 128], strides = [1, 1]} : vector<2x384xf32> to vector<2x128xf32>
    %151 = vector.extract_strided_slice %133 {offsets = [0, 256], sizes = [2, 128], strides = [1, 1]} : vector<2x384xf32> to vector<2x128xf32>
    %152 = arith.addf %151, %10 : vector<2x128xf32>
    %153 = arith.mulf %141, %152 : vector<2x128xf32>
    %154 = arith.addf %150, %153 : vector<2x128xf32>
    %155 = math.tanh %154 : vector<2x128xf32>
    %cst_46 = arith.constant 1.000000e+00 : f32
    %156 = vector.broadcast %cst_46 : f32 to vector<2x128xf32>
    %157 = arith.subf %156, %149 : vector<2x128xf32>
    %158 = arith.mulf %157, %155 : vector<2x128xf32>
    %159 = arith.mulf %149, %130 : vector<2x128xf32>
    %160 = arith.addf %158, %159 : vector<2x128xf32>
    %c8_47 = arith.constant 8 : index
    %c0_48 = arith.constant 0 : index
    %161 = vector.load %arg10[%c8_47, %c0_48] : memref<16x128xf32, #tpu.memory_space<vmem>>, vector<2x128xf32>
    tpu.vector_store %arg10[%c8_47, %c0_48], %160 {strides = array<i32>} : memref<16x128xf32, #tpu.memory_space<vmem>>, vector<2x128xf32>,
    %c10 = arith.constant 10 : index
    %c0_49 = arith.constant 0 : index
    %162 = vector.load %arg9[%c10, %c0_49] : memref<16x384xf32, #tpu.memory_space<vmem>>, vector<2x384xf32>
    %cst_50 = arith.constant dense<0.000000e+00> : vector<2x384xf32>
    %163 = tpu.matmul %160, %7, %cst_50 {dimension_numbers = #tpu.dot_dimension_numbers<[1], [0], [0], [1], [0, 0, 1, 1], [], []>} : vector<2x128xf32>, vector<128x384xf32>, vector<2x384xf32> -> vector<2x384xf32>
    %164 = vector.extract_strided_slice %162 {offsets = [0, 0], sizes = [2, 128], strides = [1, 1]} : vector<2x384xf32> to vector<2x128xf32>
    %165 = vector.extract_strided_slice %163 {offsets = [0, 0], sizes = [2, 128], strides = [1, 1]} : vector<2x384xf32> to vector<2x128xf32>
    %166 = arith.addf %164, %165 : vector<2x128xf32>
    %167 = arith.negf %166 : vector<2x128xf32>
    %168 = math.exp %167 : vector<2x128xf32>
    %cst_51 = arith.constant 1.000000e+00 : f32
    %169 = vector.broadcast %cst_51 : f32 to vector<2x128xf32>
    %170 = arith.addf %169, %168 : vector<2x128xf32>
    %171 = arith.divf %169, %170 : vector<2x128xf32>
    %172 = vector.extract_strided_slice %162 {offsets = [0, 128], sizes = [2, 128], strides = [1, 1]} : vector<2x384xf32> to vector<2x128xf32>
    %173 = vector.extract_strided_slice %163 {offsets = [0, 128], sizes = [2, 128], strides = [1, 1]} : vector<2x384xf32> to vector<2x128xf32>
    %174 = arith.addf %172, %173 : vector<2x128xf32>
    %175 = arith.negf %174 : vector<2x128xf32>
    %176 = math.exp %175 : vector<2x128xf32>
    %cst_52 = arith.constant 1.000000e+00 : f32
    %177 = vector.broadcast %cst_52 : f32 to vector<2x128xf32>
    %178 = arith.addf %177, %176 : vector<2x128xf32>
    %179 = arith.divf %177, %178 : vector<2x128xf32>
    %180 = vector.extract_strided_slice %162 {offsets = [0, 256], sizes = [2, 128], strides = [1, 1]} : vector<2x384xf32> to vector<2x128xf32>
    %181 = vector.extract_strided_slice %163 {offsets = [0, 256], sizes = [2, 128], strides = [1, 1]} : vector<2x384xf32> to vector<2x128xf32>
    %182 = arith.addf %181, %10 : vector<2x128xf32>
    %183 = arith.mulf %171, %182 : vector<2x128xf32>
    %184 = arith.addf %180, %183 : vector<2x128xf32>
    %185 = math.tanh %184 : vector<2x128xf32>
    %cst_53 = arith.constant 1.000000e+00 : f32
    %186 = vector.broadcast %cst_53 : f32 to vector<2x128xf32>
    %187 = arith.subf %186, %179 : vector<2x128xf32>
    %188 = arith.mulf %187, %185 : vector<2x128xf32>
    %189 = arith.mulf %179, %160 : vector<2x128xf32>
    %190 = arith.addf %188, %189 : vector<2x128xf32>
    %c10_54 = arith.constant 10 : index
    %c0_55 = arith.constant 0 : index
    %191 = vector.load %arg10[%c10_54, %c0_55] : memref<16x128xf32, #tpu.memory_space<vmem>>, vector<2x128xf32>
    tpu.vector_store %arg10[%c10_54, %c0_55], %190 {strides = array<i32>} : memref<16x128xf32, #tpu.memory_space<vmem>>, vector<2x128xf32>,
    %c12 = arith.constant 12 : index
    %c0_56 = arith.constant 0 : index
    %192 = vector.load %arg9[%c12, %c0_56] : memref<16x384xf32, #tpu.memory_space<vmem>>, vector<2x384xf32>
    %cst_57 = arith.constant dense<0.000000e+00> : vector<2x384xf32>
    %193 = tpu.matmul %190, %7, %cst_57 {dimension_numbers = #tpu.dot_dimension_numbers<[1], [0], [0], [1], [0, 0, 1, 1], [], []>} : vector<2x128xf32>, vector<128x384xf32>, vector<2x384xf32> -> vector<2x384xf32>
    %194 = vector.extract_strided_slice %192 {offsets = [0, 0], sizes = [2, 128], strides = [1, 1]} : vector<2x384xf32> to vector<2x128xf32>
    %195 = vector.extract_strided_slice %193 {offsets = [0, 0], sizes = [2, 128], strides = [1, 1]} : vector<2x384xf32> to vector<2x128xf32>
    %196 = arith.addf %194, %195 : vector<2x128xf32>
    %197 = arith.negf %196 : vector<2x128xf32>
    %198 = math.exp %197 : vector<2x128xf32>
    %cst_58 = arith.constant 1.000000e+00 : f32
    %199 = vector.broadcast %cst_58 : f32 to vector<2x128xf32>
    %200 = arith.addf %199, %198 : vector<2x128xf32>
    %201 = arith.divf %199, %200 : vector<2x128xf32>
    %202 = vector.extract_strided_slice %192 {offsets = [0, 128], sizes = [2, 128], strides = [1, 1]} : vector<2x384xf32> to vector<2x128xf32>
    %203 = vector.extract_strided_slice %193 {offsets = [0, 128], sizes = [2, 128], strides = [1, 1]} : vector<2x384xf32> to vector<2x128xf32>
    %204 = arith.addf %202, %203 : vector<2x128xf32>
    %205 = arith.negf %204 : vector<2x128xf32>
    %206 = math.exp %205 : vector<2x128xf32>
    %cst_59 = arith.constant 1.000000e+00 : f32
    %207 = vector.broadcast %cst_59 : f32 to vector<2x128xf32>
    %208 = arith.addf %207, %206 : vector<2x128xf32>
    %209 = arith.divf %207, %208 : vector<2x128xf32>
    %210 = vector.extract_strided_slice %192 {offsets = [0, 256], sizes = [2, 128], strides = [1, 1]} : vector<2x384xf32> to vector<2x128xf32>
    %211 = vector.extract_strided_slice %193 {offsets = [0, 256], sizes = [2, 128], strides = [1, 1]} : vector<2x384xf32> to vector<2x128xf32>
    %212 = arith.addf %211, %10 : vector<2x128xf32>
    %213 = arith.mulf %201, %212 : vector<2x128xf32>
    %214 = arith.addf %210, %213 : vector<2x128xf32>
    %215 = math.tanh %214 : vector<2x128xf32>
    %cst_60 = arith.constant 1.000000e+00 : f32
    %216 = vector.broadcast %cst_60 : f32 to vector<2x128xf32>
    %217 = arith.subf %216, %209 : vector<2x128xf32>
    %218 = arith.mulf %217, %215 : vector<2x128xf32>
    %219 = arith.mulf %209, %190 : vector<2x128xf32>
    %220 = arith.addf %218, %219 : vector<2x128xf32>
    %c12_61 = arith.constant 12 : index
    %c0_62 = arith.constant 0 : index
    %221 = vector.load %arg10[%c12_61, %c0_62] : memref<16x128xf32, #tpu.memory_space<vmem>>, vector<2x128xf32>
    tpu.vector_store %arg10[%c12_61, %c0_62], %220 {strides = array<i32>} : memref<16x128xf32, #tpu.memory_space<vmem>>, vector<2x128xf32>,
    %c14 = arith.constant 14 : index
    %c0_63 = arith.constant 0 : index
    %222 = vector.load %arg9[%c14, %c0_63] : memref<16x384xf32, #tpu.memory_space<vmem>>, vector<2x384xf32>
    %cst_64 = arith.constant dense<0.000000e+00> : vector<2x384xf32>
    %223 = tpu.matmul %220, %7, %cst_64 {dimension_numbers = #tpu.dot_dimension_numbers<[1], [0], [0], [1], [0, 0, 1, 1], [], []>} : vector<2x128xf32>, vector<128x384xf32>, vector<2x384xf32> -> vector<2x384xf32>
    %224 = vector.extract_strided_slice %222 {offsets = [0, 0], sizes = [2, 128], strides = [1, 1]} : vector<2x384xf32> to vector<2x128xf32>
    %225 = vector.extract_strided_slice %223 {offsets = [0, 0], sizes = [2, 128], strides = [1, 1]} : vector<2x384xf32> to vector<2x128xf32>
    %226 = arith.addf %224, %225 : vector<2x128xf32>
    %227 = arith.negf %226 : vector<2x128xf32>
    %228 = math.exp %227 : vector<2x128xf32>
    %cst_65 = arith.constant 1.000000e+00 : f32
    %229 = vector.broadcast %cst_65 : f32 to vector<2x128xf32>
    %230 = arith.addf %229, %228 : vector<2x128xf32>
    %231 = arith.divf %229, %230 : vector<2x128xf32>
    %232 = vector.extract_strided_slice %222 {offsets = [0, 128], sizes = [2, 128], strides = [1, 1]} : vector<2x384xf32> to vector<2x128xf32>
    %233 = vector.extract_strided_slice %223 {offsets = [0, 128], sizes = [2, 128], strides = [1, 1]} : vector<2x384xf32> to vector<2x128xf32>
    %234 = arith.addf %232, %233 : vector<2x128xf32>
    %235 = arith.negf %234 : vector<2x128xf32>
    %236 = math.exp %235 : vector<2x128xf32>
    %cst_66 = arith.constant 1.000000e+00 : f32
    %237 = vector.broadcast %cst_66 : f32 to vector<2x128xf32>
    %238 = arith.addf %237, %236 : vector<2x128xf32>
    %239 = arith.divf %237, %238 : vector<2x128xf32>
    %240 = vector.extract_strided_slice %222 {offsets = [0, 256], sizes = [2, 128], strides = [1, 1]} : vector<2x384xf32> to vector<2x128xf32>
    %241 = vector.extract_strided_slice %223 {offsets = [0, 256], sizes = [2, 128], strides = [1, 1]} : vector<2x384xf32> to vector<2x128xf32>
    %242 = arith.addf %241, %10 : vector<2x128xf32>
    %243 = arith.mulf %231, %242 : vector<2x128xf32>
    %244 = arith.addf %240, %243 : vector<2x128xf32>
    %245 = math.tanh %244 : vector<2x128xf32>
    %cst_67 = arith.constant 1.000000e+00 : f32
    %246 = vector.broadcast %cst_67 : f32 to vector<2x128xf32>
    %247 = arith.subf %246, %239 : vector<2x128xf32>
    %248 = arith.mulf %247, %245 : vector<2x128xf32>
    %249 = arith.mulf %239, %220 : vector<2x128xf32>
    %250 = arith.addf %248, %249 : vector<2x128xf32>
    %c14_68 = arith.constant 14 : index
    %c0_69 = arith.constant 0 : index
    %251 = vector.load %arg10[%c14_68, %c0_69] : memref<16x128xf32, #tpu.memory_space<vmem>>, vector<2x128xf32>
    tpu.vector_store %arg10[%c14_68, %c0_69], %250 {strides = array<i32>} : memref<16x128xf32, #tpu.memory_space<vmem>>, vector<2x128xf32>,
    %c0_70 = arith.constant 0 : index
    %c0_71 = arith.constant 0 : index
    %252 = vector.load %arg10[%c0_70, %c0_71] : memref<16x128xf32, #tpu.memory_space<vmem>>, vector<16x128xf32>
    %c0_72 = arith.constant 0 : index
    %c0_73 = arith.constant 0 : index
    %253 = vector.load %arg6[%c0_72, %c0_73] : memref<128x128xf32, #tpu.memory_space<vmem>>, vector<128x128xf32>
    %cst_74 = arith.constant dense<0.000000e+00> : vector<16x128xf32>
    %254 = tpu.matmul %252, %253, %cst_74 {dimension_numbers = #tpu.dot_dimension_numbers<[1], [0], [0], [1], [0, 0, 1, 1], [], []>} : vector<16x128xf32>, vector<128x128xf32>, vector<16x128xf32> -> vector<16x128xf32>
    %c0_75 = arith.constant 0 : index
    %c0_76 = arith.constant 0 : index
    %255 = vector.load %arg7[%c0_75, %c0_76] : memref<1x128xf32, #tpu.memory_space<vmem>>, vector<1x128xf32>
    %256 = vector.broadcast %255 : vector<1x128xf32> to vector<16x128xf32>
    %257 = arith.addf %254, %256 : vector<16x128xf32>
    %c0_77 = arith.constant 0 : index
    %c0_78 = arith.constant 0 : index
    %258 = vector.load %arg8[%c0_77, %c0_78] : memref<16x128xf32, #tpu.memory_space<vmem>>, vector<16x128xf32>
    tpu.vector_store %arg8[%c0_77, %c0_78], %257 {strides = array<i32>} : memref<16x128xf32, #tpu.memory_space<vmem>>, vector<16x128xf32>,
    return
  }
}

</mosaic_0001>

<bundles_post_ra>
// kernel: param_sorter_forward.1
= control target key start
LH: loop header
LB: loop body
LE: loop exit
PB: predicated region body
PF: predicated region fallthrough
CT: control target
= control target key end

     0   :  { %13 = vsyncpa [#allocation5], 0  ;;  %s3521_s0 = inlined_call_operand.vmem [shape: f32[2,128], index: 0, kind: input, shape index: {}]   ;;  %s3522_s1 = inlined_call_operand.vmem [shape: f32[16,32], index: 1, kind: input, shape index: {}]   ;;  %s3523_s2 = inlined_call_operand.hbm [shape: f32[32,384], index: 2, kind: input, shape index: {}]   ;;  %s3524_s3 = inlined_call_operand.hbm [shape: f32[128,384], index: 3, kind: input, shape index: {}]   ;;  %s3525_s4 = inlined_call_operand.vmem [shape: f32[1,384], index: 4, kind: input, shape index: {}]   ;;  %s3526_s5 = inlined_call_operand.vmem [shape: f32[1,128], index: 5, kind: input, shape index: {}]   ;;  %s3527_s6 = inlined_call_operand.hbm [shape: f32[128,128], index: 6, kind: input, shape index: {}]   ;;  %s3528_s7 = inlined_call_operand.vmem [shape: f32[1,128], index: 7, kind: input, shape index: {}]   ;;  %s3529_s8 = inlined_call_operand.vmem [shape: f32[16,128], index: 8, kind: output, shape index: {}]  }
   0x1   :  { %14 = vsyncpa [#allocation7], 0  ;;  %s3013_s27 = smov [#allocation6]   ;;  %s3014_s29 = smov [#allocation4]  }
   0x2   :  { %s36_s28 = sshll.u32 %s3013_s27, 4  ;;  %s24_s30 = sshll.u32 %s3014_s29, 4  ;;  %s37_s28 = int_to_ptr.vmem [resolvable:$true] %s36_s28  ;;  %s3068_s30 = int_to_ptr.vmem [resolvable:$true] %s24_s30 }
   0x3   :  { %s2943_s11 = scalar_lea.hbm %s3524_s3, 6144 }
   0x4   :  { %p2944_p0 = scmp.ne.s32.totalorder %s3524_s3, %s2943_s11  ;;  %p2947_p1 = scmp.lt.u32.totalorder %s2943_s11, %s3524_s3 }
   0x6   :  { %p2949_p2 = pnand %p2947_p1, %p2944_p0 }
   0x8   :  { %2952 = shalt.err (!%p2949_p2)
}
   0x9   :  { %s2953_s16 = scalar_lea.vmem %s37_s28, 6144  ;;  %p2958_p4 = scmp.lt.s32.totalorder %s37_s28, %s37_s28 }
   0xa   :  { %p2954_p3 = scmp.ne.s32.totalorder %s37_s28, %s2953_s16  ;;  %p2959_p5 = scmp.lt.s32.totalorder %s2953_s16, %s2953_s16 }
   0xc   :  { %p2960_p6 = por %p2959_p5, %p2958_p4 }
   0xe   :  { %p2961_p7 = pnand %p2960_p6, %p2954_p3 }
  0x10   :  { %2964 = shalt.err (!%p2961_p7)
}
  0x11   :  { %s3015_s17 = smov 384   ;;  %s3016_s18 = smov 24  }
  0x12   :  { %42 = dma.hbm_to_vmem [thread:$0]  %s3524_s3, 6144, %s37_s28, [#allocation7], %s3015_s17, %s3015_s17, %s3016_s18  }
  0x13   :  { %s2965_s23 = scalar_lea.hbm %s3523_s2, 1536 }
  0x14   :  { %p2966_p8 = scmp.ne.s32.totalorder %s3523_s2, %s2965_s23  ;;  %p2969_p9 = scmp.lt.u32.totalorder %s2965_s23, %s3523_s2 }
  0x16   :  { %p2971_p10 = pnand %p2969_p9, %p2966_p8 }
  0x18   :  { %2974 = shalt.err (!%p2971_p10)
}
  0x19   :  { %s2975_s29 = scalar_lea.vmem %s3068_s30, 1536  ;;  %p2980_p12 = scmp.lt.s32.totalorder %s3068_s30, %s3068_s30 }
  0x1a   :  { %p2976_p11 = scmp.ne.s32.totalorder %s3068_s30, %s2975_s29  ;;  %p2981_p13 = scmp.lt.s32.totalorder %s2975_s29, %s2975_s29 }
  0x1c   :  { %p2982_p0 = por %p2981_p13, %p2980_p12 }
  0x1e   :  { %p2983_p1 = pnand %p2982_p0, %p2976_p11 }
  0x20   :  { %2986 = shalt.err (!%p2983_p1)
}
  0x21   :  { %30 = dma.hbm_to_vmem [thread:$0]  %s3523_s2, 1536, %s3068_s30, [#allocation5], %s3015_s17, %s3015_s17, %s3016_s18  }
  0x22   :  { %s3017_s9 = smov [#allocation8]   ;;  %s2987_s13 = scalar_lea.hbm %s3527_s6, 2048 }
  0x23   :  { %s52_s10 = sshll.u32 %s3017_s9, 4  ;;  %p2988_p2 = scmp.ne.s32.totalorder %s3527_s6, %s2987_s13  ;;  %s53_s10 = int_to_ptr.vmem [resolvable:$true] %s52_s10 }
  0x24   :  { %p2991_p3 = scmp.lt.u32.totalorder %s2987_s13, %s3527_s6 }
  0x26   :  { %p2993_p4 = pnand %p2991_p3, %p2988_p2 }
  0x28   :  { %2996 = shalt.err (!%p2993_p4)
}
  0x29   :  { %s2997_s20 = scalar_lea.vmem %s53_s10, 2048  ;;  %p3002_p6 = scmp.lt.s32.totalorder %s53_s10, %s53_s10 }
  0x2a   :  { %p2998_p5 = scmp.ne.s32.totalorder %s53_s10, %s2997_s20  ;;  %p3003_p7 = scmp.lt.s32.totalorder %s2997_s20, %s2997_s20 }
  0x2c   :  { %p3004_p8 = por %p3003_p7, %p3002_p6 }
  0x2e   :  { %p3005_p9 = pnand %p3004_p8, %p2998_p5 }
  0x30   :  { %3008 = shalt.err (!%p3005_p9)
}
  0x31   :  { %s3018_s2 = smov 128   ;;  %s3019_s30 = smov 8  }
  0x32   :  { %58 = dma.hbm_to_vmem [thread:$0]  %s3527_s6, 2048, %s53_s10, [#allocation7], %s3018_s2, %s3018_s2, %s3019_s30  }
  0x33   :  { %3009 = dma.done.wait [#allocation5], 1536  }
  0x34   :  { %3010 = vsyncadd [#allocation5], 4294965760 }
  0x35   :  { %3011 = dma.done.wait [#allocation7], 8192  }
  0x36   :  { %3012 = vsyncadd [#allocation7], 4294959104  ;;  %v3020_v0 = vmov 0.0   ;;  %v267_v1 = vld [vmem:[#allocation6 + $0x8] sm:$0xff]  ;;  %v270_v2 = vld [vmem:[#allocation6 + $0x20] sm:$0xff]  ;;  %vm101_vm0 = vcmask 261120  }
  0x37   :  { %172 = vmatprep.mubr.f32.mxu1 %v3020_v0  ;;  %389 = vmatprep.mubr.f32.mxu0 %v3020_v0  ;;  %v266_v3 = vld [vmem:[#allocation6] sm:$0xff]  ;;  %v3113_v4 = vpack.c.bf16 %v270_v2, %v267_v1  ;;  %v269_v5 = vld [vmem:[#allocation6 + $0x18] sm:$0xff]  ;;  %v276_v7 = vld [vmem:[#allocation6 + $0x50] sm:$0xff]  ;;  %vm3022_vm1 = vmmov 0  }
  0x38   :  { %v273_v6 = vld [vmem:[#allocation6 + $0x38] sm:$0xff]  ;;  %v3115_v8 = vpack.c.bf16 %v269_v5, %v266_v3  ;;  %v272_v10 = vld [vmem:[#allocation6 + $0x30] sm:$0xff]  ;;  %v275_v11 = vld [vmem:[#allocation6 + $0x48] sm:$0xff]  ;;  %v3021_v5 = vmov 0.0|0.0  }
  0x39   :  { %v3117_v9 = vpack.c.bf16 %v276_v7, %v273_v6  ;;  %v279_v12 = vld [vmem:[#allocation6 + $0x68] sm:$0xff]  ;;  %2374 = vmatprep.subr.bf16.mxu0 %v3113_v4  ;;  %v282_v13 = vld [vmem:[#allocation6 + $0x80] sm:$0xff]  ;;  %v3121_v16 = vpack.c.bf16 %v275_v11, %v272_v10  ;;  %v281_v21 = vld [vmem:[#allocation6 + $0x78] sm:$0xff] }
  0x3a   :  { %v73_v14 = vld [vmem:[#allocation4 + $0x8] sm:$0xff]  ;;  %v76_v15 = vld [vmem:[#allocation4 + $0x20] sm:$0xff]  ;;  %2376 = vmatpush1.bf16.msra.mxu0 %v3115_v8  ;;  %v3124_v20 = vpack.c.bf16 %v282_v13, %v279_v12  ;;  %v75_v22 = vld [vmem:[#allocation4 + $0x18] sm:$0xff] }
  0x3b   :  { %v2357_v17 = vpack.c.bf16 %v76_v15, %v73_v14  ;;  %v278_v18 = vld [vmem:[#allocation6 + $0x60] sm:$0xff]  ;;  %2378 = vmatprep.subr.bf16.mxu0 %v3117_v9  ;;  %v285_v23 = vld [vmem:[#allocation6 + $0x98] sm:$0xff]  ;;  %v288_v25 = vld [vmem:[#allocation6 + $0xb0] sm:$0xff] }
  0x3c   :  { %v72_v19 = vld [vmem:[#allocation4] sm:$0xff]  ;;  %v79_v26 = vld [vmem:[#allocation4 + $0x38] sm:$0xff]  ;;  %v82_v27 = vld [vmem:[#allocation4 + $0x50] sm:$0xff]  ;;  %v3127_v31 = vpack.c.bf16 %v281_v21, %v278_v18  ;;  %v3130_v34 = vpack.c.bf16 %v288_v25, %v285_v23 }
  0x3d   :  { %2358 = vmatprep.subr.bf16.mxu1 %v2357_v17  ;;  %v2359_v24 = vpack.c.bf16 %v75_v22, %v72_v19  ;;  %v2361_v28 = vpack.c.bf16 %v82_v27, %v79_v26  ;;  %v78_v29 = vld [vmem:[#allocation4 + $0x30] sm:$0xff]  ;;  %v81_v30 = vld [vmem:[#allocation4 + $0x48] sm:$0xff]  ;;  %v294_v39 = vld [vmem:[#allocation6 + $0xe0] sm:$0xff] }
  0x3e   :  { %2380 = vmatpush1.bf16.msra.mxu0 %v3121_v16  ;;  %v2363_v32 = vpack.c.bf16 %v81_v30, %v78_v29  ;;  %v74_v33 = vld [vmem:[#allocation4 + $0x10] sm:$0xff]  ;;  %v287_v36 = vld [vmem:[#allocation6 + $0xa8] sm:$0xff]  ;;  %v80_v41 = vld [vmem:[#allocation4 + $0x40] sm:$0xff] }
  0x3f   :  { %2360 = vmatpush1.bf16.msra.mxu1 %v2359_v24  ;;  %2382 = vmatprep.subr.bf16.mxu0 %v3124_v20  ;;  %v284_v35 = vld [vmem:[#allocation6 + $0x90] sm:$0xff]  ;;  %v77_v37 = vld [vmem:[#allocation4 + $0x28] sm:$0xff]  ;;  %v83_v42 = vld [vmem:[#allocation4 + $0x58] sm:$0xff] }
  0x40   :  { %2362 = vmatprep.subr.bf16.mxu1 %v2361_v28  ;;  %v291_v38 = vld [vmem:[#allocation6 + $0xc8] sm:$0xff]  ;;  %v2365_v40 = vpack.c.bf16 %v77_v37, %v74_v33  ;;  %v3133_v43 = vpack.c.bf16 %v287_v36, %v284_v35  ;;  %v70_v44 = vld [vmem:[%s3522_s1] sm:$0xff]  ;;  %v293_v47 = vld [vmem:[#allocation6 + $0xd8] sm:$0xff]  ;;  %v2369_v50 = vpack.c.bf16 %v83_v42, %v80_v41 }
  0x41   :  { %v3139_v45 = vpack.c.bf16 %v294_v39, %v291_v38  ;;  %v290_v46 = vld [vmem:[#allocation6 + $0xc0] sm:$0xff]  ;;  %v297_v48 = vld [vmem:[#allocation6 + $0xf8] sm:$0xff]  ;;  %v300_v49 = vld [vmem:[#allocation6 + $0x110] sm:$0xff]  ;;  %v86_v39 = vlaneseq }
  0x42   :  { %2384 = vmatpush1.bf16.msra.mxu0 %v3127_v31  ;;  %v3143_v51 = vpack.c.bf16 %v293_v47, %v290_v46  ;;  %v296_v52 = vld [vmem:[#allocation6 + $0xf0] sm:$0xff]  ;;  %v71_v53 = vld [vmem:[%s3522_s1 + $0x8] sm:$0xff]  ;;  %v3149_v54 = vpack.c.bf16 %v300_v49, %v297_v48  ;;  %v306_v59 = vld [vmem:[#allocation6 + $0x140] sm:$0xff] }
  0x43   :  { %2364 = vmatpush1.bf16.msra.mxu1 %v2363_v32  ;;  %2386 = vmatprep.subr.bf16.mxu0 %v3130_v34  ;;  %v299_v55 = vld [vmem:[#allocation6 + $0x108] sm:$0xff]  ;;  %v268_v56 = vld [vmem:[#allocation6 + $0x10] sm:$0xff]  ;;  %v302_v61 = vld [vmem:[#allocation6 + $0x120] sm:$0xff] }
  0x44   :  { %2366 = vmatprep.subr.bf16.mxu1 %v2365_v40  ;;  %v271_v57 = vld [vmem:[#allocation6 + $0x28] sm:$0xff]  ;;  %v3154_v60 = vpack.c.bf16 %v299_v55, %v296_v52  ;;  %v305_v1 = vld [vmem:[#allocation6 + $0x138] sm:$0xff]  ;;  %v274_v2 = vld [vmem:[#allocation6 + $0x40] sm:$0xff] }
  0x45   :  { %v303_v58 = vld [vmem:[#allocation6 + $0x128] sm:$0xff]  ;;  %v3156_v62 = vpack.c.bf16 %v271_v57, %v268_v56  ;;  %v277_v3 = vld [vmem:[#allocation6 + $0x58] sm:$0xff]  ;;  %v312_v7 = vld [vmem:[#allocation6 + $0x170] sm:$0xff]  ;;  %v3165_v10 = vpack.c.bf16 %v305_v1, %v302_v61 }
  0x46   :  { %1849 = vmatmul.mubr.msk.f32.vlgmr.msra.gmra.mrb[0].mxu1 %vm101_vm0, %v70_v44  ;;  %2388 = vmatpush1.bf16.msra.mxu0 %v3133_v43  ;;  %v3159_v63 = vpack.c.bf16 %v306_v59, %v303_v58  ;;  %v309_v6 = vld [vmem:[#allocation6 + $0x158] sm:$0xff]  ;;  %v308_v11 = vld [vmem:[#allocation6 + $0x150] sm:$0xff]  ;;  %v3168_v12 = vpack.c.bf16 %v277_v3, %v274_v2  ;;  %v311_v14 = vld [vmem:[#allocation6 + $0x168] sm:$0xff] }
  0x47   :  { %2368 = vmatpush3.bf16.msra.mxu1 %v2365_v40  ;;  %2390 = vmatprep.subr.bf16.mxu0 %v3139_v45  ;;  %v3171_v13 = vpack.c.bf16 %v312_v7, %v309_v6  ;;  %v280_v15 = vld [vmem:[#allocation6 + $0x70] sm:$0xff]  ;;  %v283_v17 = vld [vmem:[#allocation6 + $0x88] sm:$0xff]  ;;  %v3177_v18 = vpack.c.bf16 %v311_v14, %v308_v11  ;;  %v286_v21 = vld [vmem:[#allocation6 + $0xa0] sm:$0xff]  ;;  %v87_v40 = vshrl.u32 %v86_v39, 7 }
  0x48   :  { %178 = vmatprep.mubr.f32.mxu1 %v3020_v0  ;;  %2370 = vmatprep.subr.bf16.mxu1 %v2369_v50  ;;  %v3180_v19 = vpack.c.bf16 %v283_v17, %v280_v15  ;;  %v289_v22 = vld [vmem:[#allocation6 + $0xb8] sm:$0xff]  ;;  %v3188_v23 = vld [vmem:[%s3521_s0] sm:$0x3]  ;;  %v292_v25 = vld [vmem:[#allocation6 + $0xd0] sm:$0xff] }
  0x49   :  { %v3191_v24 = vpack.c.bf16 %v289_v22, %v286_v21  ;;  %v295_v26 = vld [vmem:[#allocation6 + $0xe8] sm:$0xff]  ;;  %v298_v28 = vld [vmem:[#allocation6 + $0x100] sm:$0xff]  ;;  %v301_v29 = vld [vmem:[#allocation6 + $0x118] sm:$0xff]  ;;  %v88_v41 = vsub.s32 0, %v87_v40  ;;  %v96_v52 = vsub.s32 2, %v87_v40 }
  0x4a   :  { %1850 = vmatmul.mubr.msk.f32.gmra.mrb[2].mxu1 %vm101_vm0, %v71_v53  ;;  %2392 = vmatpush1.bf16.msra.mxu0 %v3143_v51  ;;  %v3197_v27 = vpack.c.bf16 %v295_v26, %v292_v25  ;;  %v3204_v30 = vpack.c.bf16 %v301_v29, %v298_v28  ;;  %v304_v32 = vld [vmem:[#allocation6 + $0x130] sm:$0xff]  ;;  %v307_v33 = vld [vmem:[#allocation6 + $0x148] sm:$0xff]  ;;  %v310_v36 = vld [vmem:[#allocation6 + $0x160] sm:$0xff] }
  0x4b   :  { %2372 = vmatpush3.bf16.msra.mxu1 %v2369_v50  ;;  %2394 = vmatprep.subr.bf16.mxu0 %v3149_v54  ;;  %v3210_v35 = vpack.c.bf16 %v307_v33, %v304_v32  ;;  %v313_v37 = vld [vmem:[#allocation6 + $0x178] sm:$0xff]  ;;  %v84_v42 = vld [vmem:[%s3525_s4] sm:$0x7] }
  0x4c   :  { %2039 = vmatprep.mubr.msk.f32.mxu1 %vm101_vm0, %v70_v44  ;;  %2405 = vmatprep.subr.bf16.mxu1 %v3021_v5  ;;  %v3216_v38 = vpack.c.bf16 %v313_v37, %v310_v36  ;;  %v92_v44 = vsub.s32 1, %v87_v40  ;;  %v89_v46 = vrot.slane %v84_v42, %v88_v41  ;;  %v97_v58 = vrot.slane %v84_v42, %v96_v52  ;;  %v3256_v33 = vld [vmem:[%s3526_s5] ss:$0 sm:$0xff] }
  0x4e   :  { %2040 = vmatmul.mubr.msk.f32.vlgmr.msra.gmra.mrb[4].mxu1 %vm101_vm0, %v71_v53  ;;  %2396 = vmatpush1.bf16.msra.mxu0 %v3154_v60  ;;  %v93_v47 = vrot.slane %v84_v42, %v92_v44 }
  0x4f   :  { %2407 = vmatpush3.bf16.msra.mxu1 %v3156_v62  ;;  %2398 = vmatprep.subr.bf16.mxu0 %v3159_v63 }
  0x50   :  { %2408 = vmatprep.subr.bf16.mxu1 %v3021_v5  ;;  %2074 = vmatprep.mubr.msk.f32.mxu1 %vm3022_vm1, %v3020_v0 }
  0x52   :  { %2400 = vmatpush1.bf16.msra.mxu0 %v3165_v10 }
  0x53   :  { %2410 = vmatpush3.bf16.msra.mxu1 %v3168_v12  ;;  %2402 = vmatprep.subr.bf16.mxu0 %v3171_v13 }
  0x54   :  { %2411 = vmatprep.subr.bf16.mxu1 %v3021_v5 }
  0x56   :  { %2404 = vmatpush1.bf16.msra.mxu0 %v3177_v18 }
  0x57   :  { %2413 = vmatpush3.bf16.msra.mxu1 %v3180_v19  ;;  %2430 = vmatprep.subr.bf16.mxu0 %v3113_v4 }
  0x58   :  { %2414 = vmatprep.subr.bf16.mxu1 %v3021_v5 }
  0x59   :  { %390 = vmatmul.mubr.f32.vlgmr.msra.gmra.mrb[0].mxu0 %v3188_v23 }
  0x5a   :  { %2432 = vmatpush1.bf16.msra.mxu0 %v3115_v8  ;;  %556 = vmatprep.mubr.f32.mxu0 %v3020_v0 }
  0x5b   :  { %2416 = vmatpush3.bf16.msra.mxu1 %v3191_v24  ;;  %2434 = vmatprep.subr.bf16.mxu0 %v3117_v9 }
  0x5c   :  { %2417 = vmatprep.subr.bf16.mxu1 %v3021_v5 }
  0x5e   :  { %2436 = vmatpush1.bf16.msra.mxu0 %v3121_v16 }
  0x5f   :  { %2419 = vmatpush3.bf16.msra.mxu1 %v3197_v27  ;;  %2438 = vmatprep.subr.bf16.mxu0 %v3124_v20 }
  0x60   :  { %2420 = vmatprep.subr.bf16.mxu1 %v3021_v5 }
  0x62   :  { %2440 = vmatpush1.bf16.msra.mxu0 %v3127_v31 }
  0x63   :  { %2422 = vmatpush3.bf16.msra.mxu1 %v3204_v30  ;;  %2442 = vmatprep.subr.bf16.mxu0 %v3130_v34 }
  0x64   :  { %2423 = vmatprep.subr.bf16.mxu1 %v3021_v5 }
  0x66   :  { %2444 = vmatpush1.bf16.msra.mxu0 %v3133_v43 }
  0x67   :  { %2425 = vmatpush3.bf16.msra.mxu1 %v3210_v35  ;;  %2446 = vmatprep.subr.bf16.mxu0 %v3139_v45 }
  0x68   :  { %2426 = vmatprep.subr.bf16.mxu1 %v3021_v5 }
  0x6a   :  { %2448 = vmatpush1.bf16.msra.mxu0 %v3143_v51 }
  0x6b   :  { %2428 = vmatpush3.bf16.msra.mxu1 %v3216_v38  ;;  %2450 = vmatprep.subr.bf16.mxu0 %v3149_v54 }
  0x6c   :  { %2461 = vmatprep.subr.bf16.mxu1 %v3021_v5 }
  0x6e   :  { %2075 = vmatmul.mubr.f32.vlgmr.msra.gmra.mrb[6].mxu1 %v3188_v23  ;;  %2452 = vmatpush1.bf16.msra.mxu0 %v3154_v60 }
  0x6f   :  { %2463 = vmatpush3.bf16.msra.mxu1 %v3156_v62  ;;  %2454 = vmatprep.subr.bf16.mxu0 %v3159_v63 }
  0x70   :  { %2464 = vmatprep.subr.bf16.mxu1 %v3021_v5  ;;  %2109 = vmatprep.mubr.msk.f32.mxu1 %vm3022_vm1, %v3020_v0 }
  0x72   :  { %2456 = vmatpush1.bf16.msra.mxu0 %v3165_v10 }
  0x73   :  { %2466 = vmatpush3.bf16.msra.mxu1 %v3168_v12  ;;  %2458 = vmatprep.subr.bf16.mxu0 %v3171_v13 }
  0x74   :  { %2467 = vmatprep.subr.bf16.mxu1 %v3021_v5 }
  0x76   :  { %2460 = vmatpush1.bf16.msra.mxu0 %v3177_v18 }
  0x77   :  { %2469 = vmatpush3.bf16.msra.mxu1 %v3180_v19  ;;  %2486 = vmatprep.subr.bf16.mxu0 %v3113_v4 }
  0x78   :  { %2470 = vmatprep.subr.bf16.mxu1 %v3021_v5 }
  0x7b   :  { %2472 = vmatpush3.bf16.msra.mxu1 %v3191_v24 }
  0x7c   :  { %2473 = vmatprep.subr.bf16.mxu1 %v3021_v5 }
  0x7f   :  { %2475 = vmatpush3.bf16.msra.mxu1 %v3197_v27 }
  0x80   :  { %2476 = vmatprep.subr.bf16.mxu1 %v3021_v5 }
  0x83   :  { %2478 = vmatpush3.bf16.msra.mxu1 %v3204_v30 }
  0x84   :  { %2479 = vmatprep.subr.bf16.mxu1 %v3021_v5 }
  0x87   :  { %2481 = vmatpush3.bf16.msra.mxu1 %v3210_v35 }
  0x88   :  { %2482 = vmatprep.subr.bf16.mxu1 %v3021_v5 }
  0x8b   :  { %2484 = vmatpush3.bf16.msra.mxu1 %v3216_v38 }
  0x8c   :  { %2517 = vmatprep.subr.bf16.mxu1 %v3021_v5 }
 0x119   :  { %v174_v48 = vpop.f32.mrb[0].mxu1 }
 0x11a   :  { %v175_v49 = vadd.f32 %v174_v48, %v89_v46  ;;  %v176_v50 = vpop.f32.mrb[1].mxu1 }
 0x11b   :  { %v177_v53 = vadd.f32 %v176_v50, %v93_v47 }
 0x11c   :  { %260 = vst [vmem:[#allocation2] sm:$0xff] %v175_v49 }
 0x11d   :  { %261 = vst [vmem:[#allocation2 + $0x8] sm:$0xff] %v177_v53  ;;  %v180_v55 = vpop.f32.mrb[2].mxu1 }
 0x11e   :  { %v181_v56 = vadd.f32 %v180_v55, %v89_v46  ;;  %v182_v57 = vpop.f32.mrb[3].mxu1 }
 0x11f   :  { %v183_v59 = vadd.f32 %v182_v57, %v93_v47 }
 0x120   :  { %263 = vst [vmem:[#allocation2 + $0x18] sm:$0xff] %v181_v56 }
 0x121   :  { %264 = vst [vmem:[#allocation2 + $0x20] sm:$0xff] %v183_v59  ;;  %v2041_v61 = vpop.f32.mrb[4].mxu1 }
 0x122   :  { %v257_v1 = vadd.f32 %v2041_v61, %v97_v58  ;;  %v251_v2 = vpop.f32.mrb[5].mxu1 }
 0x123   :  { %v252_v3 = vadd.f32 %v251_v2, %v97_v58  ;;  %v322_v6 = vld [vmem:[#allocation2] sm:$0x3]  ;;  %v489_v57 = vld [vmem:[#allocation2] sm:$0xc] }
 0x124   :  { %265 = vst [vmem:[#allocation2 + $0x28] sm:$0xff] %v257_v1  ;;  %v323_v17 = vld [vmem:[#allocation2 + $0x8] sm:$0x3]  ;;  %v490_v61 = vld [vmem:[#allocation2 + $0x8] sm:$0xc] }
 0x125   :  { %262 = vst [vmem:[#allocation2 + $0x10] sm:$0xff] %v252_v3 }
 0x12c   :  { %v391_v7 = vpop.f32.mrb[0].mxu0  ;;  %v324_v41 = vld [vmem:[#allocation2 + $0x10] sm:$0x3] }
 0x12d   :  { %v466_v11 = vadd.f32 %v391_v7, %v322_v6  ;;  %v393_v14 = vpop.f32.mrb[1].mxu0 }
 0x12e   :  { %v473_v21 = vadd.f32 %v393_v14, %v323_v17 }
 0x12f   :  { %v1854_v15 = vmul.f32 -1.442695, %v466_v11 }
 0x130   :  { %v1855_v22 = vmul.f32 -1.442695, %v473_v21 }
 0x131   :  { %2863 = vpow2.f32 %v1854_v15 }
 0x132   :  { %2865 = vpow2.f32 %v1855_v22 }
 0x13b   :  { %v2864_v25 = vpop.eup %2863 }
 0x13c   :  { %v470_v26 = vadd.f32 1.0, %v2864_v25  ;;  %v2866_v32 = vpop.eup %2865 }
 0x13d   :  { %v477_v36 = vadd.f32 1.0, %v2866_v32 }
 0x13e   :  { %2867 = vrcp.f32 %v470_v26 }
 0x13f   :  { %2869 = vrcp.f32 %v477_v36 }
 0x141   :  { %v462_v28 = vpop.f32.mrb[6].mxu1 }
 0x142   :  { %v2076_v29 = vpop.f32.mrb[7].mxu1  ;;  %v480_v37 = vadd.f32 %v3256_v33, %v462_v28  ;;  %v491_v28 = vld [vmem:[#allocation2 + $0x10] sm:$0xc] }
 0x148   :  { %v2868_v39 = vpop.eup %2867 }
 0x149   :  { %v481_v40 = vmul.f32 %v2868_v39, %v480_v37  ;;  %v2870_v44 = vpop.eup %2869 }
 0x14a   :  { %v484_v46 = vsub.f32 1.0, %v2870_v44  ;;  %v486_v49 = vmul.f32 %v2870_v44, %v3188_v23 }
 0x14b   :  { %v482_v42 = vadd.f32 %v481_v40, %v324_v41 }
 0x14d   :  { %2871 = vtanh.f32 %v482_v42 }
 0x157   :  { %v2872_v47 = vpop.eup %2871 }
 0x158   :  { %v485_v48 = vmul.f32 %v2872_v47, %v484_v46 }
 0x15a   :  { %v3260_v50 = vadd.f32 %v486_v49, %v485_v48  ;;  %v668_v49 = vld [vmem:[#allocation2] sm:$0x30] }
 0x15c   :  { %488 = vst [vmem:[#allocation3] sm:$0x3] %v3260_v50  ;;  %557 = vmatmul.mubr.f32.vlgmr.msra.gmra.mrb[2].mxu0 %v3260_v50  ;;  %2110 = vmatmul.mubr.f32.vlgmr.msra.gmra.mrb[8].mxu1 %v3260_v50  ;;  %v663_v22 = vrot.slane %v3260_v50, 6 }
 0x15d   :  { %2488 = vmatpush1.bf16.msra.mxu0 %v3115_v8  ;;  %2519 = vmatpush3.bf16.msra.mxu1 %v3156_v62 }
 0x15e   :  { %2490 = vmatprep.subr.bf16.mxu0 %v3117_v9  ;;  %2520 = vmatprep.subr.bf16.mxu1 %v3021_v5 }
 0x15f   :  { %738 = vmatprep.mubr.f32.mxu0 %v3020_v0  ;;  %2144 = vmatprep.mubr.msk.f32.mxu1 %vm3022_vm1, %v3020_v0 }
 0x161   :  { %2492 = vmatpush1.bf16.msra.mxu0 %v3121_v16  ;;  %2522 = vmatpush3.bf16.msra.mxu1 %v3168_v12 }
 0x162   :  { %2494 = vmatprep.subr.bf16.mxu0 %v3124_v20  ;;  %2523 = vmatprep.subr.bf16.mxu1 %v3021_v5 }
 0x165   :  { %2496 = vmatpush1.bf16.msra.mxu0 %v3127_v31  ;;  %2525 = vmatpush3.bf16.msra.mxu1 %v3180_v19 }
 0x166   :  { %2498 = vmatprep.subr.bf16.mxu0 %v3130_v34  ;;  %2526 = vmatprep.subr.bf16.mxu1 %v3021_v5 }
 0x169   :  { %2500 = vmatpush1.bf16.msra.mxu0 %v3133_v43  ;;  %2528 = vmatpush3.bf16.msra.mxu1 %v3191_v24 }
 0x16a   :  { %2502 = vmatprep.subr.bf16.mxu0 %v3139_v45  ;;  %2529 = vmatprep.subr.bf16.mxu1 %v3021_v5 }
 0x16d   :  { %2504 = vmatpush1.bf16.msra.mxu0 %v3143_v51  ;;  %2531 = vmatpush3.bf16.msra.mxu1 %v3197_v27 }
 0x16e   :  { %2506 = vmatprep.subr.bf16.mxu0 %v3149_v54  ;;  %2532 = vmatprep.subr.bf16.mxu1 %v3021_v5 }
 0x171   :  { %2508 = vmatpush1.bf16.msra.mxu0 %v3154_v60  ;;  %2534 = vmatpush3.bf16.msra.mxu1 %v3204_v30 }
 0x172   :  { %2510 = vmatprep.subr.bf16.mxu0 %v3159_v63  ;;  %2535 = vmatprep.subr.bf16.mxu1 %v3021_v5 }
 0x175   :  { %2512 = vmatpush1.bf16.msra.mxu0 %v3165_v10  ;;  %2537 = vmatpush3.bf16.msra.mxu1 %v3210_v35 }
 0x176   :  { %2514 = vmatprep.subr.bf16.mxu0 %v3171_v13  ;;  %2538 = vmatprep.subr.bf16.mxu1 %v3021_v5 }
 0x179   :  { %2516 = vmatpush1.bf16.msra.mxu0 %v3177_v18  ;;  %2540 = vmatpush3.bf16.msra.mxu1 %v3216_v38 }
 0x17a   :  { %2542 = vmatprep.subr.bf16.mxu0 %v3113_v4  ;;  %2573 = vmatprep.subr.bf16.mxu1 %v3021_v5 }
 0x22f   :  { %v558_v23 = vpop.f32.mrb[2].mxu0  ;;  %v629_v52 = vpop.f32.mrb[8].mxu1 }
 0x230   :  { %v634_v53 = vrot.slane %v558_v23, 6  ;;  %v560_v55 = vpop.f32.mrb[3].mxu0  ;;  %v2111_v56 = vpop.f32.mrb[9].mxu1  ;;  %v653_v15 = vadd.f32 %v3256_v33, %v629_v52  ;;  %v669_v52 = vld [vmem:[#allocation2 + $0x8] sm:$0x30] }
 0x231   :  { %v644_v58 = vrot.slane %v560_v55, 6 }
 0x232   :  { %v636_v59 = vadd.f32 %v634_v53, %v489_v57  ;;  %v655_v17 = vrot.slane %v653_v15, 6 }
 0x233   :  { %v646_v1 = vadd.f32 %v644_v58, %v490_v61 }
 0x234   :  { %v1856_v2 = vmul.f32 -1.442695, %v636_v59 }
 0x235   :  { %v1857_v3 = vmul.f32 -1.442695, %v646_v1 }
 0x236   :  { %2873 = vpow2.f32 %v1856_v2 }
 0x237   :  { %2875 = vpow2.f32 %v1857_v3 }
 0x240   :  { %v2874_v6 = vpop.eup %2873 }
 0x241   :  { %v2876_v7 = vpop.eup %2875  ;;  %v640_v11 = vadd.f32 1.0, %v2874_v6 }
 0x242   :  { %v650_v14 = vadd.f32 1.0, %v2876_v7 }
 0x243   :  { %2877 = vrcp.f32 %v640_v11 }
 0x244   :  { %2879 = vrcp.f32 %v650_v14  ;;  %v670_v14 = vld [vmem:[#allocation2 + $0x10] sm:$0x30] }
 0x24d   :  { %v2878_v21 = vpop.eup %2877 }
 0x24e   :  { %v2880_v25 = vpop.eup %2879  ;;  %v657_v26 = vmul.f32 %v2878_v21, %v655_v17 }
 0x24f   :  { %v665_v29 = vmul.f32 %v2880_v25, %v663_v22  ;;  %v660_v36 = vsub.f32 1.0, %v2880_v25 }
 0x250   :  { %v658_v32 = vadd.f32 %v657_v26, %v491_v28 }
 0x252   :  { %2881 = vtanh.f32 %v658_v32 }
 0x25c   :  { %v2882_v37 = vpop.eup %2881 }
 0x25d   :  { %v661_v39 = vmul.f32 %v2882_v37, %v660_v36 }
 0x25f   :  { %v3302_v40 = vadd.f32 %v665_v29, %v661_v39 }
 0x261   :  { %667 = vst [vmem:[#allocation3] sm:$0xc] %v3302_v40  ;;  %v672_v41 = vrot.slane %v3302_v40, 2  ;;  %v844_v6 = vrot.slane %v3302_v40, 6  ;;  %v849_v40 = vld [vmem:[#allocation2] sm:$0xc0] }
 0x263   :  { %739 = vmatmul.mubr.f32.vlgmr.msra.gmra.mrb[4].mxu0 %v672_v41  ;;  %2145 = vmatmul.mubr.f32.vlgmr.msra.gmra.mrb[10].mxu1 %v672_v41 }
 0x264   :  { %2544 = vmatpush1.bf16.msra.mxu0 %v3115_v8  ;;  %2575 = vmatpush3.bf16.msra.mxu1 %v3156_v62 }
 0x265   :  { %2546 = vmatprep.subr.bf16.mxu0 %v3117_v9  ;;  %2576 = vmatprep.subr.bf16.mxu1 %v3021_v5 }
 0x266   :  { %919 = vmatprep.mubr.f32.mxu0 %v3020_v0  ;;  %2179 = vmatprep.mubr.msk.f32.mxu1 %vm3022_vm1, %v3020_v0 }
 0x268   :  { %2548 = vmatpush1.bf16.msra.mxu0 %v3121_v16  ;;  %2578 = vmatpush3.bf16.msra.mxu1 %v3168_v12 }
 0x269   :  { %2550 = vmatprep.subr.bf16.mxu0 %v3124_v20  ;;  %2579 = vmatprep.subr.bf16.mxu1 %v3021_v5 }
 0x26c   :  { %2552 = vmatpush1.bf16.msra.mxu0 %v3127_v31  ;;  %2581 = vmatpush3.bf16.msra.mxu1 %v3180_v19 }
 0x26d   :  { %2554 = vmatprep.subr.bf16.mxu0 %v3130_v34  ;;  %2582 = vmatprep.subr.bf16.mxu1 %v3021_v5 }
 0x270   :  { %2556 = vmatpush1.bf16.msra.mxu0 %v3133_v43  ;;  %2584 = vmatpush3.bf16.msra.mxu1 %v3191_v24 }
 0x271   :  { %2558 = vmatprep.subr.bf16.mxu0 %v3139_v45  ;;  %2585 = vmatprep.subr.bf16.mxu1 %v3021_v5 }
 0x274   :  { %2560 = vmatpush1.bf16.msra.mxu0 %v3143_v51  ;;  %2587 = vmatpush3.bf16.msra.mxu1 %v3197_v27 }
 0x275   :  { %2562 = vmatprep.subr.bf16.mxu0 %v3149_v54  ;;  %2588 = vmatprep.subr.bf16.mxu1 %v3021_v5 }
 0x278   :  { %2564 = vmatpush1.bf16.msra.mxu0 %v3154_v60  ;;  %2590 = vmatpush3.bf16.msra.mxu1 %v3204_v30 }
 0x279   :  { %2566 = vmatprep.subr.bf16.mxu0 %v3159_v63  ;;  %2591 = vmatprep.subr.bf16.mxu1 %v3021_v5 }
 0x27c   :  { %2568 = vmatpush1.bf16.msra.mxu0 %v3165_v10  ;;  %2593 = vmatpush3.bf16.msra.mxu1 %v3210_v35 }
 0x27d   :  { %2570 = vmatprep.subr.bf16.mxu0 %v3171_v13  ;;  %2594 = vmatprep.subr.bf16.mxu1 %v3021_v5 }
 0x280   :  { %2572 = vmatpush1.bf16.msra.mxu0 %v3177_v18  ;;  %2596 = vmatpush3.bf16.msra.mxu1 %v3216_v38 }
 0x281   :  { %2598 = vmatprep.subr.bf16.mxu0 %v3113_v4  ;;  %2629 = vmatprep.subr.bf16.mxu1 %v3021_v5 }
 0x336   :  { %v740_v42 = vpop.f32.mrb[4].mxu0  ;;  %v811_v44 = vpop.f32.mrb[10].mxu1 }
 0x337   :  { %v816_v46 = vrot.slane %v740_v42, 4  ;;  %v742_v47 = vpop.f32.mrb[5].mxu0  ;;  %v2146_v48 = vpop.f32.mrb[11].mxu1  ;;  %v835_v1 = vadd.f32 %v3256_v33, %v811_v44  ;;  %v850_v44 = vld [vmem:[#allocation2 + $0x8] sm:$0xc0] }
 0x338   :  { %v826_v50 = vrot.slane %v742_v47, 4 }
 0x339   :  { %v818_v23 = vadd.f32 %v816_v46, %v668_v49  ;;  %v837_v2 = vrot.slane %v835_v1, 4 }
 0x33a   :  { %v828_v53 = vadd.f32 %v826_v50, %v669_v52 }
 0x33b   :  { %v1858_v55 = vmul.f32 -1.442695, %v818_v23 }
 0x33c   :  { %v1859_v56 = vmul.f32 -1.442695, %v828_v53 }
 0x33d   :  { %2883 = vpow2.f32 %v1858_v55 }
 0x33e   :  { %2885 = vpow2.f32 %v1859_v56 }
 0x347   :  { %v2884_v57 = vpop.eup %2883 }
 0x348   :  { %v2886_v58 = vpop.eup %2885  ;;  %v822_v59 = vadd.f32 1.0, %v2884_v57 }
 0x349   :  { %v832_v61 = vadd.f32 1.0, %v2886_v58 }
 0x34a   :  { %2887 = vrcp.f32 %v822_v59 }
 0x34b   :  { %2889 = vrcp.f32 %v832_v61  ;;  %v851_v61 = vld [vmem:[#allocation2 + $0x10] sm:$0xc0] }
 0x354   :  { %v2888_v3 = vpop.eup %2887 }
 0x355   :  { %v2890_v7 = vpop.eup %2889  ;;  %v839_v11 = vmul.f32 %v2888_v3, %v837_v2 }
 0x356   :  { %v846_v15 = vmul.f32 %v2890_v7, %v844_v6  ;;  %v842_v21 = vsub.f32 1.0, %v2890_v7 }
 0x357   :  { %v840_v17 = vadd.f32 %v839_v11, %v670_v14 }
 0x359   :  { %2891 = vtanh.f32 %v840_v17 }
 0x363   :  { %v2892_v22 = vpop.eup %2891 }
 0x364   :  { %v843_v25 = vmul.f32 %v2892_v22, %v842_v21 }
 0x366   :  { %v3343_v26 = vadd.f32 %v846_v15, %v843_v25  ;;  %v1030_v15 = vld [vmem:[#allocation2 + $0x18] sm:$0x3] }
 0x368   :  { %848 = vst [vmem:[#allocation3] sm:$0x30] %v3343_v26  ;;  %v853_v28 = vrot.slane %v3343_v26, 4  ;;  %v1025_v57 = vrot.slane %v3343_v26, 6 }
 0x36a   :  { %920 = vmatmul.mubr.f32.vlgmr.msra.gmra.mrb[6].mxu0 %v853_v28  ;;  %2180 = vmatmul.mubr.f32.vlgmr.msra.gmra.mrb[12].mxu1 %v853_v28 }
 0x36b   :  { %2600 = vmatpush1.bf16.msra.mxu0 %v3115_v8  ;;  %2631 = vmatpush3.bf16.msra.mxu1 %v3156_v62 }
 0x36c   :  { %2602 = vmatprep.subr.bf16.mxu0 %v3117_v9  ;;  %2632 = vmatprep.subr.bf16.mxu1 %v3021_v5 }
 0x36d   :  { %1100 = vmatprep.mubr.f32.mxu0 %v3020_v0  ;;  %2214 = vmatprep.mubr.msk.f32.mxu1 %vm3022_vm1, %v3020_v0 }
 0x36f   :  { %2604 = vmatpush1.bf16.msra.mxu0 %v3121_v16  ;;  %2634 = vmatpush3.bf16.msra.mxu1 %v3168_v12 }
 0x370   :  { %2606 = vmatprep.subr.bf16.mxu0 %v3124_v20  ;;  %2635 = vmatprep.subr.bf16.mxu1 %v3021_v5 }
 0x373   :  { %2608 = vmatpush1.bf16.msra.mxu0 %v3127_v31  ;;  %2637 = vmatpush3.bf16.msra.mxu1 %v3180_v19 }
 0x374   :  { %2610 = vmatprep.subr.bf16.mxu0 %v3130_v34  ;;  %2638 = vmatprep.subr.bf16.mxu1 %v3021_v5 }
 0x377   :  { %2612 = vmatpush1.bf16.msra.mxu0 %v3133_v43  ;;  %2640 = vmatpush3.bf16.msra.mxu1 %v3191_v24 }
 0x378   :  { %2614 = vmatprep.subr.bf16.mxu0 %v3139_v45  ;;  %2641 = vmatprep.subr.bf16.mxu1 %v3021_v5 }
 0x37b   :  { %2616 = vmatpush1.bf16.msra.mxu0 %v3143_v51  ;;  %2643 = vmatpush3.bf16.msra.mxu1 %v3197_v27 }
 0x37c   :  { %2618 = vmatprep.subr.bf16.mxu0 %v3149_v54  ;;  %2644 = vmatprep.subr.bf16.mxu1 %v3021_v5 }
 0x37f   :  { %2620 = vmatpush1.bf16.msra.mxu0 %v3154_v60  ;;  %2646 = vmatpush3.bf16.msra.mxu1 %v3204_v30 }
 0x380   :  { %2622 = vmatprep.subr.bf16.mxu0 %v3159_v63  ;;  %2647 = vmatprep.subr.bf16.mxu1 %v3021_v5 }
 0x383   :  { %2624 = vmatpush1.bf16.msra.mxu0 %v3165_v10  ;;  %2649 = vmatpush3.bf16.msra.mxu1 %v3210_v35 }
 0x384   :  { %2626 = vmatprep.subr.bf16.mxu0 %v3171_v13  ;;  %2650 = vmatprep.subr.bf16.mxu1 %v3021_v5 }
 0x387   :  { %2628 = vmatpush1.bf16.msra.mxu0 %v3177_v18  ;;  %2652 = vmatpush3.bf16.msra.mxu1 %v3216_v38 }
 0x388   :  { %2654 = vmatprep.subr.bf16.mxu0 %v3113_v4  ;;  %2685 = vmatprep.subr.bf16.mxu1 %v3021_v5 }
 0x43d   :  { %v921_v29 = vpop.f32.mrb[6].mxu0  ;;  %v992_v32 = vpop.f32.mrb[12].mxu1 }
 0x43e   :  { %v997_v36 = vrot.slane %v921_v29, 2  ;;  %v923_v37 = vpop.f32.mrb[7].mxu0  ;;  %v2181_v39 = vpop.f32.mrb[13].mxu1  ;;  %v1016_v53 = vadd.f32 %v3256_v33, %v992_v32  ;;  %v1031_v29 = vld [vmem:[#allocation2 + $0x20] sm:$0x3] }
 0x43f   :  { %v1007_v41 = vrot.slane %v923_v37, 2 }
 0x440   :  { %v999_v42 = vadd.f32 %v997_v36, %v849_v40  ;;  %v1018_v55 = vrot.slane %v1016_v53, 2 }
 0x441   :  { %v1009_v46 = vadd.f32 %v1007_v41, %v850_v44 }
 0x442   :  { %v1860_v47 = vmul.f32 -1.442695, %v999_v42 }
 0x443   :  { %v1861_v48 = vmul.f32 -1.442695, %v1009_v46 }
 0x444   :  { %2893 = vpow2.f32 %v1860_v47  ;;  %v1032_v47 = vld [vmem:[#allocation2 + $0x28] sm:$0x3] }
 0x445   :  { %2895 = vpow2.f32 %v1861_v48 }
 0x44e   :  { %v2894_v49 = vpop.eup %2893 }
 0x44f   :  { %v2896_v50 = vpop.eup %2895  ;;  %v1003_v23 = vadd.f32 1.0, %v2894_v49 }
 0x450   :  { %v1013_v52 = vadd.f32 1.0, %v2896_v50 }
 0x451   :  { %2897 = vrcp.f32 %v1003_v23 }
 0x452   :  { %2899 = vrcp.f32 %v1013_v52 }
 0x45b   :  { %v2898_v56 = vpop.eup %2897 }
 0x45c   :  { %v2900_v58 = vpop.eup %2899  ;;  %v1020_v59 = vmul.f32 %v2898_v56, %v1018_v55 }
 0x45d   :  { %v1027_v1 = vmul.f32 %v2900_v58, %v1025_v57  ;;  %v1023_v3 = vsub.f32 1.0, %v2900_v58 }
 0x45e   :  { %v1021_v2 = vadd.f32 %v1020_v59, %v851_v61 }
 0x460   :  { %2901 = vtanh.f32 %v1021_v2 }
 0x46a   :  { %v2902_v6 = vpop.eup %2901 }
 0x46b   :  { %v1024_v7 = vmul.f32 %v2902_v6, %v1023_v3  ;;  %v1201_v6 = vld [vmem:[#allocation2 + $0x20] sm:$0xc] }
 0x46d   :  { %v1028_v11 = vadd.f32 %v1027_v1, %v1024_v7  ;;  %v1200_v1 = vld [vmem:[#allocation2 + $0x18] sm:$0xc] }
 0x46f   :  { %1029 = vst [vmem:[#allocation3] sm:$0xc0] %v1028_v11  ;;  %v3384_v14 = vrot.slane %v1028_v11, 6 }
 0x471   :  { %1101 = vmatmul.mubr.f32.vlgmr.msra.gmra.mrb[8].mxu0 %v3384_v14  ;;  %2215 = vmatmul.mubr.f32.vlgmr.msra.gmra.mrb[14].mxu1 %v3384_v14 }
 0x472   :  { %2656 = vmatpush1.bf16.msra.mxu0 %v3115_v8  ;;  %2687 = vmatpush3.bf16.msra.mxu1 %v3156_v62 }
 0x473   :  { %2658 = vmatprep.subr.bf16.mxu0 %v3117_v9  ;;  %2688 = vmatprep.subr.bf16.mxu1 %v3021_v5 }
 0x474   :  { %1267 = vmatprep.mubr.f32.mxu0 %v3020_v0  ;;  %2249 = vmatprep.mubr.msk.f32.mxu1 %vm3022_vm1, %v3020_v0 }
 0x476   :  { %2660 = vmatpush1.bf16.msra.mxu0 %v3121_v16  ;;  %2690 = vmatpush3.bf16.msra.mxu1 %v3168_v12 }
 0x477   :  { %2662 = vmatprep.subr.bf16.mxu0 %v3124_v20  ;;  %2691 = vmatprep.subr.bf16.mxu1 %v3021_v5 }
 0x47a   :  { %2664 = vmatpush1.bf16.msra.mxu0 %v3127_v31  ;;  %2693 = vmatpush3.bf16.msra.mxu1 %v3180_v19 }
 0x47b   :  { %2666 = vmatprep.subr.bf16.mxu0 %v3130_v34  ;;  %2694 = vmatprep.subr.bf16.mxu1 %v3021_v5 }
 0x47e   :  { %2668 = vmatpush1.bf16.msra.mxu0 %v3133_v43  ;;  %2696 = vmatpush3.bf16.msra.mxu1 %v3191_v24 }
 0x47f   :  { %2670 = vmatprep.subr.bf16.mxu0 %v3139_v45  ;;  %2697 = vmatprep.subr.bf16.mxu1 %v3021_v5 }
 0x482   :  { %2672 = vmatpush1.bf16.msra.mxu0 %v3143_v51  ;;  %2699 = vmatpush3.bf16.msra.mxu1 %v3197_v27 }
 0x483   :  { %2674 = vmatprep.subr.bf16.mxu0 %v3149_v54  ;;  %2700 = vmatprep.subr.bf16.mxu1 %v3021_v5 }
 0x486   :  { %2676 = vmatpush1.bf16.msra.mxu0 %v3154_v60  ;;  %2702 = vmatpush3.bf16.msra.mxu1 %v3204_v30 }
 0x487   :  { %2678 = vmatprep.subr.bf16.mxu0 %v3159_v63  ;;  %2703 = vmatprep.subr.bf16.mxu1 %v3021_v5 }
 0x48a   :  { %2680 = vmatpush1.bf16.msra.mxu0 %v3165_v10  ;;  %2705 = vmatpush3.bf16.msra.mxu1 %v3210_v35 }
 0x48b   :  { %2682 = vmatprep.subr.bf16.mxu0 %v3171_v13  ;;  %2706 = vmatprep.subr.bf16.mxu1 %v3021_v5 }
 0x48e   :  { %2684 = vmatpush1.bf16.msra.mxu0 %v3177_v18  ;;  %2708 = vmatpush3.bf16.msra.mxu1 %v3216_v38 }
 0x48f   :  { %2710 = vmatprep.subr.bf16.mxu0 %v3113_v4  ;;  %2741 = vmatprep.subr.bf16.mxu1 %v3021_v5 }
 0x544   :  { %v1102_v17 = vpop.f32.mrb[8].mxu0  ;;  %v1173_v21 = vpop.f32.mrb[14].mxu1 }
 0x545   :  { %v1177_v22 = vadd.f32 %v1102_v17, %v1030_v15  ;;  %v1104_v25 = vpop.f32.mrb[9].mxu0  ;;  %v2216_v26 = vpop.f32.mrb[15].mxu1  ;;  %v1191_v42 = vadd.f32 %v3256_v33, %v1173_v21 }
 0x546   :  { %v1184_v32 = vadd.f32 %v1104_v25, %v1031_v29 }
 0x547   :  { %v1862_v28 = vmul.f32 -1.442695, %v1177_v22 }
 0x548   :  { %v1863_v36 = vmul.f32 -1.442695, %v1184_v32 }
 0x549   :  { %2903 = vpow2.f32 %v1862_v28 }
 0x54a   :  { %2905 = vpow2.f32 %v1863_v36  ;;  %v1202_v36 = vld [vmem:[#allocation2 + $0x28] sm:$0xc] }
 0x553   :  { %v2904_v37 = vpop.eup %2903 }
 0x554   :  { %v1181_v39 = vadd.f32 1.0, %v2904_v37  ;;  %v2906_v40 = vpop.eup %2905 }
 0x555   :  { %v1188_v41 = vadd.f32 1.0, %v2906_v40 }
 0x556   :  { %2907 = vrcp.f32 %v1181_v39 }
 0x557   :  { %2909 = vrcp.f32 %v1188_v41 }
 0x560   :  { %v2908_v44 = vpop.eup %2907 }
 0x561   :  { %v1192_v46 = vmul.f32 %v2908_v44, %v1191_v42  ;;  %v2910_v49 = vpop.eup %2909 }
 0x562   :  { %v1195_v50 = vsub.f32 1.0, %v2910_v49  ;;  %v1197_v53 = vmul.f32 %v2910_v49, %v3384_v14 }
 0x563   :  { %v1193_v48 = vadd.f32 %v1192_v46, %v1032_v47 }
 0x565   :  { %2911 = vtanh.f32 %v1193_v48 }
 0x56f   :  { %v2912_v23 = vpop.eup %2911 }
 0x570   :  { %v1196_v52 = vmul.f32 %v2912_v23, %v1195_v50 }
 0x572   :  { %v3425_v55 = vadd.f32 %v1197_v53, %v1196_v52  ;;  %v1741_v52 = vld [vmem:[#allocation3] sm:$0xff]  ;;  %v1743_v53 = vld [vmem:[#allocation8] sm:$0xff] }
 0x574   :  { %1199 = vst [vmem:[#allocation3 + $0x8] sm:$0x3] %v3425_v55  ;;  %1268 = vmatmul.mubr.f32.vlgmr.msra.gmra.mrb[10].mxu0 %v3425_v55  ;;  %2250 = vmatmul.mubr.f32.vlgmr.msra.gmra.mrb[16].mxu1 %v3425_v55  ;;  %v1374_v28 = vrot.slane %v3425_v55, 6  ;;  %v1744_v55 = vld [vmem:[#allocation8 + $0x8] sm:$0xff] }
 0x575   :  { %2712 = vmatpush1.bf16.msra.mxu0 %v3115_v8  ;;  %2743 = vmatpush3.bf16.msra.mxu1 %v3156_v62 }
 0x576   :  { %2714 = vmatprep.subr.bf16.mxu0 %v3117_v9  ;;  %2744 = vmatprep.subr.bf16.mxu1 %v3021_v5 }
 0x577   :  { %1449 = vmatprep.mubr.f32.mxu0 %v3020_v0  ;;  %2284 = vmatprep.mubr.msk.f32.mxu1 %vm3022_vm1, %v3020_v0 }
 0x579   :  { %2716 = vmatpush1.bf16.msra.mxu0 %v3121_v16  ;;  %2746 = vmatpush3.bf16.msra.mxu1 %v3168_v12 }
 0x57a   :  { %2718 = vmatprep.subr.bf16.mxu0 %v3124_v20  ;;  %2747 = vmatprep.subr.bf16.mxu1 %v3021_v5 }
 0x57d   :  { %2720 = vmatpush1.bf16.msra.mxu0 %v3127_v31  ;;  %2749 = vmatpush3.bf16.msra.mxu1 %v3180_v19 }
 0x57e   :  { %2722 = vmatprep.subr.bf16.mxu0 %v3130_v34  ;;  %2750 = vmatprep.subr.bf16.mxu1 %v3021_v5 }
 0x581   :  { %2724 = vmatpush1.bf16.msra.mxu0 %v3133_v43  ;;  %2752 = vmatpush3.bf16.msra.mxu1 %v3191_v24 }
 0x582   :  { %2726 = vmatprep.subr.bf16.mxu0 %v3139_v45  ;;  %2753 = vmatprep.subr.bf16.mxu1 %v3021_v5 }
 0x585   :  { %2728 = vmatpush1.bf16.msra.mxu0 %v3143_v51  ;;  %2755 = vmatpush3.bf16.msra.mxu1 %v3197_v27 }
 0x586   :  { %2730 = vmatprep.subr.bf16.mxu0 %v3149_v54  ;;  %2756 = vmatprep.subr.bf16.mxu1 %v3021_v5 }
 0x589   :  { %2732 = vmatpush1.bf16.msra.mxu0 %v3154_v60  ;;  %2758 = vmatpush3.bf16.msra.mxu1 %v3204_v30 }
 0x58a   :  { %2734 = vmatprep.subr.bf16.mxu0 %v3159_v63  ;;  %2759 = vmatprep.subr.bf16.mxu1 %v3021_v5 }
 0x58d   :  { %2736 = vmatpush1.bf16.msra.mxu0 %v3165_v10  ;;  %2761 = vmatpush3.bf16.msra.mxu1 %v3210_v35 }
 0x58e   :  { %2738 = vmatprep.subr.bf16.mxu0 %v3171_v13  ;;  %2762 = vmatprep.subr.bf16.mxu1 %v3021_v5 }
 0x591   :  { %2740 = vmatpush1.bf16.msra.mxu0 %v3177_v18  ;;  %2764 = vmatpush3.bf16.msra.mxu1 %v3216_v38 }
 0x592   :  { %2766 = vmatprep.subr.bf16.mxu0 %v3113_v4  ;;  %2797 = vmatprep.subr.bf16.mxu1 %v3021_v5 }
 0x647   :  { %v1269_v56 = vpop.f32.mrb[10].mxu0  ;;  %v1340_v57 = vpop.f32.mrb[16].mxu1 }
 0x648   :  { %v1345_v58 = vrot.slane %v1269_v56, 6  ;;  %v1271_v59 = vpop.f32.mrb[11].mxu0  ;;  %v2251_v61 = vpop.f32.mrb[17].mxu1  ;;  %v1364_v22 = vadd.f32 %v3256_v33, %v1340_v57  ;;  %v2821_v56 = vpack.c.bf16 %v1744_v55, %v1743_v53  ;;  %v1745_v57 = vld [vmem:[#allocation8 + $0x10] sm:$0xff] }
 0x649   :  { %v1355_v2 = vrot.slane %v1271_v59, 6  ;;  %v1747_v61 = vld [vmem:[#allocation8 + $0x20] sm:$0xff] }
 0x64a   :  { %v1347_v3 = vadd.f32 %v1345_v58, %v1200_v1  ;;  %v1366_v25 = vrot.slane %v1364_v22, 6  ;;  %v1746_v58 = vld [vmem:[#allocation8 + $0x18] sm:$0xff]  ;;  %v1748_v1 = vld [vmem:[#allocation8 + $0x28] sm:$0xff]  ;;  %v1755_v22 = vld [vmem:[#allocation8 + $0x60] sm:$0xff] }
 0x64b   :  { %v1357_v7 = vadd.f32 %v1355_v2, %v1201_v6  ;;  %v2825_v59 = vpack.c.bf16 %v1746_v58, %v1745_v57  ;;  %v2829_v2 = vpack.c.bf16 %v1748_v1, %v1747_v61  ;;  %v1750_v6 = vld [vmem:[#allocation8 + $0x38] sm:$0xff] }
 0x64c   :  { %v1864_v11 = vmul.f32 -1.442695, %v1347_v3  ;;  %v1749_v3 = vld [vmem:[#allocation8 + $0x30] sm:$0xff] }
 0x64d   :  { %v1865_v14 = vmul.f32 -1.442695, %v1357_v7  ;;  %v2833_v7 = vpack.c.bf16 %v1750_v6, %v1749_v3 }
 0x64e   :  { %2913 = vpow2.f32 %v1864_v11  ;;  %v1751_v11 = vld [vmem:[#allocation8 + $0x40] sm:$0xff] }
 0x64f   :  { %2915 = vpow2.f32 %v1865_v14  ;;  %v1752_v14 = vld [vmem:[#allocation8 + $0x48] sm:$0xff] }
 0x658   :  { %v2914_v15 = vpop.eup %2913 }
 0x659   :  { %v2916_v17 = vpop.eup %2915  ;;  %v1351_v21 = vadd.f32 1.0, %v2914_v15  ;;  %v2837_v15 = vpack.c.bf16 %v1752_v14, %v1751_v11 }
 0x65a   :  { %v1361_v4 = vadd.f32 1.0, %v2916_v17  ;;  %v1753_v17 = vld [vmem:[#allocation8 + $0x50] sm:$0xff] }
 0x65b   :  { %2917 = vrcp.f32 %v1351_v21  ;;  %v1754_v21 = vld [vmem:[#allocation8 + $0x58] sm:$0xff] }
 0x65c   :  { %2919 = vrcp.f32 %v1361_v4  ;;  %v2841_v4 = vpack.c.bf16 %v1754_v21, %v1753_v17 }
 0x665   :  { %v2918_v26 = vpop.eup %2917 }
 0x666   :  { %v2920_v29 = vpop.eup %2919  ;;  %v1368_v32 = vmul.f32 %v2918_v26, %v1366_v25  ;;  %v1756_v25 = vld [vmem:[#allocation8 + $0x68] sm:$0xff] }
 0x667   :  { %v1376_v37 = vmul.f32 %v2920_v29, %v1374_v28  ;;  %v1371_v40 = vsub.f32 1.0, %v2920_v29  ;;  %v2845_v26 = vpack.c.bf16 %v1756_v25, %v1755_v22  ;;  %v1757_v28 = vld [vmem:[#allocation8 + $0x70] sm:$0xff]  ;;  %v1758_v29 = vld [vmem:[#allocation8 + $0x78] sm:$0xff] }
 0x668   :  { %v1369_v39 = vadd.f32 %v1368_v32, %v1202_v36  ;;  %v2849_v32 = vpack.c.bf16 %v1758_v29, %v1757_v28 }
 0x66a   :  { %2921 = vtanh.f32 %v1369_v39 }
 0x674   :  { %v2922_v41 = vpop.eup %2921 }
 0x675   :  { %v1372_v42 = vmul.f32 %v2922_v41, %v1371_v40 }
 0x677   :  { %v3467_v44 = vadd.f32 %v1376_v37, %v1372_v42  ;;  %v1560_v42 = vld [vmem:[#allocation2 + $0x18] sm:$0xc0] }
 0x679   :  { %1378 = vst [vmem:[#allocation3 + $0x8] sm:$0xc] %v3467_v44  ;;  %v1383_v46 = vrot.slane %v3467_v44, 2 }
 0x67b   :  { %1450 = vmatmul.mubr.f32.vlgmr.msra.gmra.mrb[12].mxu0 %v1383_v46  ;;  %2285 = vmatmul.mubr.f32.vlgmr.msra.gmra.mrb[18].mxu1 %v1383_v46 }
 0x67c   :  { %2768 = vmatpush1.bf16.msra.mxu0 %v3115_v8  ;;  %2799 = vmatpush3.bf16.msra.mxu1 %v3156_v62 }
 0x67d   :  { %2770 = vmatprep.subr.bf16.mxu0 %v3117_v9  ;;  %2800 = vmatprep.subr.bf16.mxu1 %v3021_v5 }
 0x67e   :  { %1630 = vmatprep.mubr.f32.mxu0 %v3020_v0  ;;  %2319 = vmatprep.mubr.msk.f32.mxu1 %vm3022_vm1, %v3020_v0 }
 0x680   :  { %2772 = vmatpush1.bf16.msra.mxu0 %v3121_v16  ;;  %2802 = vmatpush3.bf16.msra.mxu1 %v3168_v12 }
 0x681   :  { %2774 = vmatprep.subr.bf16.mxu0 %v3124_v20  ;;  %2803 = vmatprep.subr.bf16.mxu1 %v3021_v5 }
 0x684   :  { %2776 = vmatpush1.bf16.msra.mxu0 %v3127_v31  ;;  %2805 = vmatpush3.bf16.msra.mxu1 %v3180_v19  ;;  %v1379_v31 = vld [vmem:[#allocation2 + $0x18] sm:$0x30]  ;;  %v1555_v19 = vrot.slane %v3467_v44, 6 }
 0x685   :  { %2778 = vmatprep.subr.bf16.mxu0 %v3130_v34  ;;  %2806 = vmatprep.subr.bf16.mxu1 %v3021_v5 }
 0x688   :  { %2780 = vmatpush1.bf16.msra.mxu0 %v3133_v43  ;;  %2808 = vmatpush3.bf16.msra.mxu1 %v3191_v24 }
 0x689   :  { %2782 = vmatprep.subr.bf16.mxu0 %v3139_v45  ;;  %2809 = vmatprep.subr.bf16.mxu1 %v3021_v5  ;;  %v1380_v45 = vld [vmem:[#allocation2 + $0x20] sm:$0x30] }
 0x68c   :  { %2784 = vmatpush1.bf16.msra.mxu0 %v3143_v51  ;;  %2811 = vmatpush3.bf16.msra.mxu1 %v3197_v27 }
 0x68d   :  { %2786 = vmatprep.subr.bf16.mxu0 %v3149_v54  ;;  %2812 = vmatprep.subr.bf16.mxu1 %v3021_v5 }
 0x690   :  { %2788 = vmatpush1.bf16.msra.mxu0 %v3154_v60  ;;  %2814 = vmatpush3.bf16.msra.mxu1 %v3204_v30  ;;  %v1381_v30 = vld [vmem:[#allocation2 + $0x28] sm:$0x30] }
 0x691   :  { %2790 = vmatprep.subr.bf16.mxu0 %v3159_v63  ;;  %2815 = vmatprep.subr.bf16.mxu1 %v3021_v5 }
 0x694   :  { %2792 = vmatpush1.bf16.msra.mxu0 %v3165_v10  ;;  %2817 = vmatpush3.bf16.msra.mxu1 %v3210_v35 }
 0x695   :  { %2794 = vmatprep.subr.bf16.mxu0 %v3171_v13  ;;  %2818 = vmatprep.subr.bf16.mxu1 %v3021_v5 }
 0x698   :  { %2796 = vmatpush1.bf16.msra.mxu0 %v3177_v18  ;;  %2820 = vmatpush3.bf16.msra.mxu1 %v3216_v38 }
 0x699   :  { %2822 = vmatprep.subr.bf16.mxu0 %v2821_v56 }
 0x74e   :  { %v1451_v0 = vpop.f32.mrb[12].mxu0  ;;  %v1522_v8 = vpop.f32.mrb[18].mxu1 }
 0x74f   :  { %v1527_v9 = vrot.slane %v1451_v0, 4  ;;  %v1453_v16 = vpop.f32.mrb[13].mxu0  ;;  %v2286_v20 = vpop.f32.mrb[19].mxu1  ;;  %v1546_v12 = vadd.f32 %v3256_v33, %v1522_v8  ;;  %v1561_v0 = vld [vmem:[#allocation2 + $0x20] sm:$0xc0] }
 0x750   :  { %v1537_v34 = vrot.slane %v1453_v16, 4 }
 0x751   :  { %v1529_v43 = vadd.f32 %v1527_v9, %v1379_v31  ;;  %v1548_v13 = vrot.slane %v1546_v12, 4 }
 0x752   :  { %v1539_v51 = vadd.f32 %v1537_v34, %v1380_v45 }
 0x753   :  { %v1866_v54 = vmul.f32 -1.442695, %v1529_v43 }
 0x754   :  { %v1867_v60 = vmul.f32 -1.442695, %v1539_v51 }
 0x755   :  { %2923 = vpow2.f32 %v1866_v54 }
 0x756   :  { %2925 = vpow2.f32 %v1867_v60 }
 0x75f   :  { %v2924_v62 = vpop.eup %2923 }
 0x760   :  { %v2926_v63 = vpop.eup %2925  ;;  %v1533_v5 = vadd.f32 1.0, %v2924_v62 }
 0x761   :  { %v1543_v10 = vadd.f32 1.0, %v2926_v63 }
 0x762   :  { %2927 = vrcp.f32 %v1533_v5  ;;  %v1562_v5 = vld [vmem:[#allocation2 + $0x28] sm:$0xc0] }
 0x763   :  { %2929 = vrcp.f32 %v1543_v10 }
 0x76c   :  { %v2928_v18 = vpop.eup %2927 }
 0x76d   :  { %v2930_v24 = vpop.eup %2929  ;;  %v1550_v27 = vmul.f32 %v2928_v18, %v1548_v13 }
 0x76e   :  { %v1557_v35 = vmul.f32 %v2930_v24, %v1555_v19  ;;  %v1553_v47 = vsub.f32 1.0, %v2930_v24 }
 0x76f   :  { %v1551_v38 = vadd.f32 %v1550_v27, %v1381_v30 }
 0x771   :  { %2931 = vtanh.f32 %v1551_v38 }
 0x77b   :  { %v2932_v48 = vpop.eup %2931 }
 0x77c   :  { %v1554_v49 = vmul.f32 %v2932_v48, %v1553_v47 }
 0x77e   :  { %v3506_v50 = vadd.f32 %v1557_v35, %v1554_v49 }
 0x780   :  { %1559 = vst [vmem:[#allocation3 + $0x8] sm:$0x30] %v3506_v50  ;;  %v1564_v23 = vrot.slane %v3506_v50, 4  ;;  %v1736_v60 = vrot.slane %v3506_v50, 6 }
 0x782   :  { %1631 = vmatmul.mubr.f32.vlgmr.msra.gmra.mrb[14].mxu0 %v1564_v23  ;;  %2320 = vmatmul.mubr.f32.vlgmr.msra.gmra.mrb[20].mxu1 %v1564_v23 }
 0x783   :  { %2354 = vmatprep.mubr.f32.mxu0 %v1741_v52  ;;  %2824 = vmatpush3.bf16.msra.mxu0 %v2821_v56 }
 0x784   :  { %2826 = vmatprep.subr.bf16.mxu0 %v2825_v59 }
 0x787   :  { %2828 = vmatpush3.bf16.msra.mxu0 %v2825_v59 }
 0x788   :  { %2830 = vmatprep.subr.bf16.mxu0 %v2829_v2 }
 0x78b   :  { %2832 = vmatpush3.bf16.msra.mxu0 %v2829_v2 }
 0x78c   :  { %2834 = vmatprep.subr.bf16.mxu0 %v2833_v7 }
 0x78f   :  { %2836 = vmatpush3.bf16.msra.mxu0 %v2833_v7 }
 0x790   :  { %2838 = vmatprep.subr.bf16.mxu0 %v2837_v15 }
 0x793   :  { %2840 = vmatpush3.bf16.msra.mxu0 %v2837_v15 }
 0x794   :  { %2842 = vmatprep.subr.bf16.mxu0 %v2841_v4 }
 0x797   :  { %2844 = vmatpush3.bf16.msra.mxu0 %v2841_v4 }
 0x798   :  { %2846 = vmatprep.subr.bf16.mxu0 %v2845_v26 }
 0x79b   :  { %2848 = vmatpush3.bf16.msra.mxu0 %v2845_v26 }
 0x79c   :  { %2850 = vmatprep.subr.bf16.mxu0 %v2849_v32 }
 0x79f   :  { %2852 = vmatpush3.bf16.msra.mxu0 %v2849_v32 }
 0x855   :  { %v1632_v36 = vpop.f32.mrb[14].mxu0  ;;  %v1703_v37 = vpop.f32.mrb[20].mxu1 }
 0x856   :  { %v1708_v39 = vrot.slane %v1632_v36, 2  ;;  %v1634_v40 = vpop.f32.mrb[15].mxu0  ;;  %v2321_v41 = vpop.f32.mrb[21].mxu1  ;;  %v1727_v45 = vadd.f32 %v3256_v33, %v1703_v37  ;;  %v1870_v33 = vld [vmem:[%s3528_s7] ss:$0 sm:$0xff] }
 0x857   :  { %v1718_v44 = vrot.slane %v1634_v40, 2 }
 0x858   :  { %v1710_v46 = vadd.f32 %v1708_v39, %v1560_v42  ;;  %v1729_v51 = vrot.slane %v1727_v45, 2 }
 0x859   :  { %v1720_v8 = vadd.f32 %v1718_v44, %v1561_v0 }
 0x85a   :  { %v1868_v9 = vmul.f32 -1.442695, %v1710_v46 }
 0x85b   :  { %v1869_v16 = vmul.f32 -1.442695, %v1720_v8 }
 0x85c   :  { %2933 = vpow2.f32 %v1868_v9 }
 0x85d   :  { %2935 = vpow2.f32 %v1869_v16 }
 0x866   :  { %v2934_v20 = vpop.eup %2933 }
 0x867   :  { %v2936_v31 = vpop.eup %2935  ;;  %v1714_v34 = vadd.f32 1.0, %v2934_v20 }
 0x868   :  { %v1724_v43 = vadd.f32 1.0, %v2936_v31 }
 0x869   :  { %2937 = vrcp.f32 %v1714_v34 }
 0x86a   :  { %2939 = vrcp.f32 %v1724_v43 }
 0x873   :  { %v2938_v54 = vpop.eup %2937 }
 0x874   :  { %v2940_v62 = vpop.eup %2939  ;;  %v1731_v63 = vmul.f32 %v2938_v54, %v1729_v51 }
 0x875   :  { %v1738_v10 = vmul.f32 %v2940_v62, %v1736_v60  ;;  %v1734_v13 = vsub.f32 1.0, %v2940_v62 }
 0x876   :  { %v1732_v12 = vadd.f32 %v1731_v63, %v1562_v5 }
 0x878   :  { %2941 = vtanh.f32 %v1732_v12 }
 0x882   :  { %v2942_v18 = vpop.eup %2941 }
 0x883   :  { %v1735_v19 = vmul.f32 %v2942_v18, %v1734_v13 }
 0x885   :  { %v1739_v24 = vadd.f32 %v1738_v10, %v1735_v19 }
 0x887   :  { %1740 = vst [vmem:[#allocation3 + $0x8] sm:$0xc0] %v1739_v24 }
 0x88e   :  { %v1742_v27 = vld [vmem:[#allocation3 + $0x8] sm:$0xff] }
 0x88f   :  { %2355 = vmatmul.mubr.f32.vlgmr.msra.gmra.mrb[16].mxu0 %v1742_v27 }
 0x962   :  { %v2356_v30 = vpop.f32.mrb[16].mxu0 }
 0x963   :  { %v1838_v35 = vadd.f32 %v2356_v30, %v1870_v33  ;;  %v1832_v38 = vpop.f32.mrb[17].mxu0 }
 0x964   :  { %v1833_v47 = vadd.f32 %v1870_v33, %v1832_v38 }
 0x965   :  { %1842 = vst [vmem:[%s3529_s8 + $0x8] sm:$0xff] %v1838_v35 }
 0x966   :  { %1841 = vst [vmem:[%s3529_s8] sm:$0xff] %v1833_v47 }
 0x967   :  { %1847 = vsyncpa [#allocation5], 1 }
 0x968   :  { %1848 = vsyncpa [#allocation7], 1 }

</bundles_post_ra>
